<compile_context>
chip_gen: v6e
topology: v6e:2x2x1
jax: 0.10.0
libtpu: 0.0.40
codegen_flags: <defaults>
</compile_context>

<pallas_src>
import functools

import jax
import jax.numpy as jnp
from jax.experimental import pallas as pl
from jax.experimental.pallas import tpu as pltpu


# ----------------------------------------------------------------------------
# Fused Pallas kernel: conv1+BN+ReLU+maxpool -> conv2+BN+ReLU -> avgpool+FC
# ----------------------------------------------------------------------------
def _classifier_kernel(xs_ref, w1_ref, b1_ref, w2_ref, b2_ref, wt_ref, bt_ref,
                       o_ref, *, ho1, hm, ho2, c4):
    # ---- conv1 (5x5, stride 2, pad 2) + BN + ReLU --------------------------
    # xs_ref holds a space-to-depth view of the padded input, so the stride-2
    # 5x5 conv becomes a stride-1 3x3 conv here; build im2col patches with
    # static slices (everything stays in VMEM / vregs).
    x = xs_ref[0]                                          # (hc, hc, c4) bf16
    cols = []
    for a in range(3):
        for b in range(3):
            cols.append(x[a:a + ho1, b:b + ho1, :].reshape(ho1 * ho1, c4))
    p1 = jnp.concatenate(cols, axis=1)                     # (ho1*ho1, 9*c4)
    y1 = jnp.dot(p1, w1_ref[...], preferred_element_type=jnp.float32)
    y1 = jnp.maximum(y1 + b1_ref[...], 0.0)                # (ho1*ho1, 32) f32
    y1 = y1.reshape(ho1, ho1, 32)

    # ---- MaxPool2d(kernel_size=3, stride=1, padding=0) ---------------------
    m = y1[0:hm, 0:hm, :]
    for dh in range(3):
        for dw in range(3):
            if dh == 0 and dw == 0:
                continue
            m = jnp.maximum(m, y1[dh:dh + hm, dw:dw + hm, :])

    # ---- conv2 (3x3, stride 2, pad 1) + BN + ReLU --------------------------
    zr = jnp.zeros((1, hm, 32), jnp.float32)
    mp = jnp.concatenate([zr, m, zr], axis=0)              # (hm+2, hm, 32)
    zc = jnp.zeros((hm + 2, 1, 32), jnp.float32)
    mp = jnp.concatenate([zc, mp, zc], axis=1)             # (hm+2, hm+2, 32)
    rows = []
    for i in range(ho2):
        for j in range(ho2):
            parts = [mp[2 * i + dh, 2 * j + dw:2 * j + dw + 1, :]
                     for dh in range(3) for dw in range(3)]     # each (1, 32)
            rows.append(jnp.concatenate(parts, axis=1))         # (1, 288)
    p2 = jnp.concatenate(rows, axis=0).astype(jnp.bfloat16)     # (ho2*ho2, 288)
    y2 = jnp.dot(p2, w2_ref[...], preferred_element_type=jnp.float32)
    y2 = jnp.maximum(y2 + b2_ref[...], 0.0)                     # (ho2*ho2, 64)

    # ---- AdaptiveAvgPool2d(2) + NCHW flatten + Linear ----------------------
    # fc weight rows were permuted on the host to match this NHWC pooled
    # ordering, so one lane-dense (128-padded) matmul finishes the network.
    pooled = []
    for i in range(2):
        hs, he = (i * ho2) // 2, ((i + 1) * ho2 + 1) // 2
        for j in range(2):
            ws, we = (j * ho2) // 2, ((j + 1) * ho2 + 1) // 2
            acc = None
            for h in range(hs, he):
                for w in range(ws, we):
                    v = y2[h * ho2 + w:h * ho2 + w + 1, :]       # (1, 64)
                    acc = v if acc is None else acc + v
            pooled.append(acc * (1.0 / ((he - hs) * (we - ws))))
    feat = jnp.concatenate(pooled, axis=1)                       # (1, 256) f32
    logits = jnp.dot(feat.astype(jnp.bfloat16), wt_ref[...],
                     preferred_element_type=jnp.float32) + bt_ref[...]
    o_ref[0] = logits                                            # (1, ncp)


# ----------------------------------------------------------------------------
# Wrapper: host-side layout prep + single pallas_call
# ----------------------------------------------------------------------------
def classifier_forward(x_nchw, fp, num_classes):
    N, cin, H, W = x_nchw.shape
    assert H == W and H % 2 == 0, (H, W)
    c4 = 4 * cin
    hc = (H + 4) // 2                    # space-to-depth cells of padded input
    ho1 = (H + 4 - 5) // 2 + 1           # conv1 output size
    hm = ho1 - 2                         # after MaxPool(3, 1)
    ho2 = (hm - 1) // 2 + 1              # conv2 output size (pad=1, stride=2)
    ncp = fp["wt"].shape[1]              # num_classes padded to 128 lanes
    assert fp["w1"].shape[0] == 9 * c4
    assert num_classes <= ncp

    # NCHW -> NHWC, zero-pad by 2, space-to-depth (2x2 spatial -> channels).
    x = jnp.transpose(x_nchw, (0, 2, 3, 1))
    x = jnp.pad(x, ((0, 0), (2, 2), (2, 2), (0, 0)))
    x = x.reshape(N, hc, 2, hc, 2, cin).transpose(0, 1, 3, 2, 4, 5)
    x = x.reshape(N, hc, hc, c4).astype(jnp.bfloat16)

    kernel = functools.partial(_classifier_kernel,
                               ho1=ho1, hm=hm, ho2=ho2, c4=c4)
    out = pl.pallas_call(
        kernel,
        out_shape=jax.ShapeDtypeStruct((N, 1, ncp), jnp.float32),
        grid=(N,),
        in_specs=[
            pl.BlockSpec((1, hc, hc, c4), lambda i: (i, 0, 0, 0)),
            pl.BlockSpec(fp["w1"].shape, lambda i: (0, 0)),
            pl.BlockSpec(fp["b1"].shape, lambda i: (0, 0)),
            pl.BlockSpec(fp["w2"].shape, lambda i: (0, 0)),
            pl.BlockSpec(fp["b2"].shape, lambda i: (0, 0)),
            pl.BlockSpec(fp["wt"].shape, lambda i: (0, 0)),
            pl.BlockSpec(fp["bt"].shape, lambda i: (0, 0)),
        ],
        out_specs=pl.BlockSpec((1, 1, ncp), lambda i: (i, 0, 0)),
        compiler_params=pltpu.CompilerParams(
            dimension_semantics=("parallel",)),
    )(x, fp["w1"], fp["b1"], fp["w2"], fp["b2"], fp["wt"], fp["bt"])
    return out.reshape(N, ncp)[:, :num_classes]


# ----------------------------------------------------------------------------
# Host-side parameter folding (done once, outside the hot path)
# ----------------------------------------------------------------------------
def fold_params(p, eps=1e-5):
    cin = p["conv1_w"].shape[2]
    nc = p["fc_w"].shape[1]
    ncp = 128 * ((nc + 127) // 128)

    # BatchNorm (eval mode) folded into per-channel scale/bias.
    s1 = p["bn1_gamma"] * jax.lax.rsqrt(p["bn1_var"] + eps)
    b1 = (p["conv1_b"] - p["bn1_mean"]) * s1 + p["bn1_beta"]
    s2 = p["bn2_gamma"] * jax.lax.rsqrt(p["bn2_var"] + eps)
    b2 = (p["conv2_b"] - p["bn2_mean"]) * s2 + p["bn2_beta"]

    # conv1: (5,5,cin,32), stride 2 -> equivalent 3x3 stride-1 weight on the
    # space-to-depth input, flattened to (9*4*cin, 32); BN scale folded in.
    w1 = jnp.pad(p["conv1_w"], ((0, 1), (0, 1), (0, 0), (0, 0)))   # (6,6,cin,32)
    w1 = w1.reshape(3, 2, 3, 2, cin, 32).transpose(0, 2, 1, 3, 4, 5)
    w1 = w1.reshape(9 * 4 * cin, 32) * s1[None, :]

    # conv2: (3,3,32,64) -> (288, 64), BN scale folded in.
    w2 = p["conv2_w"].reshape(9 * 32, 64) * s2[None, :]

    # fc: permute rows from PyTorch NCHW-flatten order (c*4 + i*2 + j) to the
    # kernel's NHWC pooled order ((i*2+j)*64 + c); pad classes to 128 lanes.
    idx = jnp.arange(256).reshape(64, 2, 2).transpose(1, 2, 0).reshape(256)
    wt = jnp.pad(p["fc_w"][idx, :], ((0, 0), (0, ncp - nc)))
    bt = jnp.pad(p["fc_b"], (0, ncp - nc))

    return {
        "w1": w1.astype(jnp.bfloat16),
        "b1": b1.reshape(1, 32).astype(jnp.float32),
        "w2": w2.astype(jnp.bfloat16),
        "b2": b2.reshape(1, 64).astype(jnp.float32),
        "wt": wt.astype(jnp.bfloat16),
        "bt": bt.reshape(1, ncp).astype(jnp.float32),
    }


# ----------------------------------------------------------------------------
# Deterministic parameter init + plain-JAX reference + run
# ----------------------------------------------------------------------------
def make_params(key, input_channels, num_classes):
    ks = jax.random.split(key, 10)
    return {
        # conv weights stored as (kh, kw, cin, cout)
        "conv1_w": 0.1 * jax.random.normal(ks[0], (5, 5, input_channels, 32), jnp.float32),
        "conv1_b": 0.1 * jax.random.normal(ks[1], (32,), jnp.float32),
        "bn1_gamma": 1.0 + 0.1 * jax.random.normal(ks[2], (32,), jnp.float32),
        "bn1_beta": 0.1 * jax.random.normal(ks[3], (32,), jnp.float32),
        "bn1_mean": jnp.zeros((32,), jnp.float32),
        "bn1_var": jnp.ones((32,), jnp.float32),
        "conv2_w": 0.1 * jax.random.normal(ks[4], (3, 3, 32, 64), jnp.float32),
        "conv2_b": 0.1 * jax.random.normal(ks[5], (64,), jnp.float32),
        "bn2_gamma": 1.0 + 0.1 * jax.random.normal(ks[6], (64,), jnp.float32),
        "bn2_beta": 0.1 * jax.random.normal(ks[7], (64,), jnp.float32),
        "bn2_mean": jnp.zeros((64,), jnp.float32),
        "bn2_var": jnp.ones((64,), jnp.float32),
        # fc: (256, num_classes)
        "fc_w": 0.1 * jax.random.normal(ks[8], (256, num_classes), jnp.float32),
        "fc_b": 0.1 * jax.random.normal(ks[9], (num_classes,), jnp.float32),
    }


def _reference_forward(x_nchw, p, eps=1e-5):
    """Plain-JAX (XLA) reference used only for validation."""
    hi = jax.lax.Precision.HIGHEST
    y = jax.lax.conv_general_dilated(
        x_nchw, p["conv1_w"], window_strides=(2, 2), padding=((2, 2), (2, 2)),
        dimension_numbers=("NCHW", "HWIO", "NCHW"), precision=hi)
    y = y + p["conv1_b"][None, :, None, None]
    s1 = p["bn1_gamma"] * jax.lax.rsqrt(p["bn1_var"] + eps)
    y = (y - p["bn1_mean"][None, :, None, None]) * s1[None, :, None, None] \
        + p["bn1_beta"][None, :, None, None]
    y = jnp.maximum(y, 0.0)
    y = jax.lax.reduce_window(y, -jnp.inf, jax.lax.max,
                              (1, 1, 3, 3), (1, 1, 1, 1), "VALID")

    y = jax.lax.conv_general_dilated(
        y, p["conv2_w"], window_strides=(2, 2), padding=((1, 1), (1, 1)),
        dimension_numbers=("NCHW", "HWIO", "NCHW"), precision=hi)
    y = y + p["conv2_b"][None, :, None, None]
    s2 = p["bn2_gamma"] * jax.lax.rsqrt(p["bn2_var"] + eps)
    y = (y - p["bn2_mean"][None, :, None, None]) * s2[None, :, None, None] \
        + p["bn2_beta"][None, :, None, None]
    y = jnp.maximum(y, 0.0)

    hcv = y.shape[2]
    rows = []
    for i in range(2):
        hs, he = (i * hcv) // 2, ((i + 1) * hcv + 1) // 2
        cols = []
        for j in range(2):
            ws, we = (j * hcv) // 2, ((j + 1) * hcv + 1) // 2
            cols.append(jnp.mean(y[:, :, hs:he, ws:we], axis=(2, 3)))
        rows.append(jnp.stack(cols, axis=-1))        # (N, 64, 2)
    y = jnp.stack(rows, axis=-2)                     # (N, 64, 2, 2)
    feat = y.reshape(y.shape[0], -1)                 # NCHW-order flatten
    return jnp.dot(feat, p["fc_w"], precision=hi) + p["fc_b"]


if __name__ == "__main__":
    input_channels, num_classes = 4, 10
    key = jax.random.PRNGKey(0)
    pkey, xkey = jax.random.split(key)
    params = make_params(pkey, input_channels, num_classes)
    fparams = fold_params(params)

    # PyTorch-convention NCHW input.
    x = jax.random.normal(xkey, (2, input_channels, 16, 16), jnp.float32)

    fwd = jax.jit(classifier_forward, static_argnums=2)
    logits = jax.block_until_ready(fwd(x, fparams, num_classes))

    assert logits.shape == (2, num_classes), logits.shape
    assert bool(jnp.all(jnp.isfinite(logits)))

    # Validate against a plain-JAX f32 reference (bf16 MXU operands -> ~1e-2).
    ref = _reference_forward(x, params)
    max_err = float(jnp.max(jnp.abs(logits - ref)))
    assert bool(jnp.allclose(logits, ref, atol=1e-1, rtol=1e-1)), max_err

    print("KERNEL_OK")
</pallas_src>

<mosaic_0001>
module attributes {stable_mosaic.version = 11 : i64} {
  func.func @_classifier_kernel(%arg0: i32, %arg1: memref<1x10x10x16xbf16, #tpu.memory_space<vmem>>, %arg2: memref<144x32xbf16, #tpu.memory_space<vmem>>, %arg3: memref<1x32xf32, #tpu.memory_space<vmem>>, %arg4: memref<288x64xbf16, #tpu.memory_space<vmem>>, %arg5: memref<1x64xf32, #tpu.memory_space<vmem>>, %arg6: memref<256x128xbf16, #tpu.memory_space<vmem>>, %arg7: memref<1x128xf32, #tpu.memory_space<vmem>>, %arg8: memref<1x1x128xf32, #tpu.memory_space<vmem>>) attributes {dimension_semantics = [#tpu.dimension_semantics<parallel>], iteration_bounds = array<i64: 2>, scalar_prefetch = 0 : i64, scratch_operands = 0 : i64, tpu.core_type = #tpu.core_type<tc>, window_params = [{transform_indices = @transform_0, window_bounds = array<i64: 1, 10, 10, 16>}, {pipeline_mode = #tpu.pipeline_mode<synchronous>, transform_indices = @transform_1, window_bounds = array<i64: 144, 32>}, {pipeline_mode = #tpu.pipeline_mode<synchronous>, transform_indices = @transform_2, window_bounds = array<i64: 1, 32>}, {pipeline_mode = #tpu.pipeline_mode<synchronous>, transform_indices = @transform_3, window_bounds = array<i64: 288, 64>}, {pipeline_mode = #tpu.pipeline_mode<synchronous>, transform_indices = @transform_4, window_bounds = array<i64: 1, 64>}, {pipeline_mode = #tpu.pipeline_mode<synchronous>, transform_indices = @transform_5, window_bounds = array<i64: 256, 128>}, {pipeline_mode = #tpu.pipeline_mode<synchronous>, transform_indices = @transform_6, window_bounds = array<i64: 1, 128>}, {transform_indices = @transform_7, window_bounds = array<i64: 1, 1, 128>}]} {
    %c0 = arith.constant 0 : index
    %c0_0 = arith.constant 0 : index
    %c0_1 = arith.constant 0 : index
    %c0_2 = arith.constant 0 : index
    %0 = vector.load %arg1[%c0, %c0_0, %c0_1, %c0_2] : memref<1x10x10x16xbf16, #tpu.memory_space<vmem>>, vector<1x10x10x16xbf16>
    %1 = vector.shape_cast %0 : vector<1x10x10x16xbf16> to vector<10x10x16xbf16>
    %2 = vector.extract_strided_slice %1 {offsets = [0, 0, 0], sizes = [8, 8, 16], strides = [1, 1, 1]} : vector<10x10x16xbf16> to vector<8x8x16xbf16>
    %3 = vector.shape_cast %2 : vector<8x8x16xbf16> to vector<64x16xbf16>
    %4 = vector.extract_strided_slice %1 {offsets = [0, 1, 0], sizes = [8, 8, 16], strides = [1, 1, 1]} : vector<10x10x16xbf16> to vector<8x8x16xbf16>
    %5 = vector.shape_cast %4 : vector<8x8x16xbf16> to vector<64x16xbf16>
    %6 = vector.extract_strided_slice %1 {offsets = [0, 2, 0], sizes = [8, 8, 16], strides = [1, 1, 1]} : vector<10x10x16xbf16> to vector<8x8x16xbf16>
    %7 = vector.shape_cast %6 : vector<8x8x16xbf16> to vector<64x16xbf16>
    %8 = vector.extract_strided_slice %1 {offsets = [1, 0, 0], sizes = [8, 8, 16], strides = [1, 1, 1]} : vector<10x10x16xbf16> to vector<8x8x16xbf16>
    %9 = vector.shape_cast %8 : vector<8x8x16xbf16> to vector<64x16xbf16>
    %10 = vector.extract_strided_slice %1 {offsets = [1, 1, 0], sizes = [8, 8, 16], strides = [1, 1, 1]} : vector<10x10x16xbf16> to vector<8x8x16xbf16>
    %11 = vector.shape_cast %10 : vector<8x8x16xbf16> to vector<64x16xbf16>
    %12 = vector.extract_strided_slice %1 {offsets = [1, 2, 0], sizes = [8, 8, 16], strides = [1, 1, 1]} : vector<10x10x16xbf16> to vector<8x8x16xbf16>
    %13 = vector.shape_cast %12 : vector<8x8x16xbf16> to vector<64x16xbf16>
    %14 = vector.extract_strided_slice %1 {offsets = [2, 0, 0], sizes = [8, 8, 16], strides = [1, 1, 1]} : vector<10x10x16xbf16> to vector<8x8x16xbf16>
    %15 = vector.shape_cast %14 : vector<8x8x16xbf16> to vector<64x16xbf16>
    %16 = vector.extract_strided_slice %1 {offsets = [2, 1, 0], sizes = [8, 8, 16], strides = [1, 1, 1]} : vector<10x10x16xbf16> to vector<8x8x16xbf16>
    %17 = vector.shape_cast %16 : vector<8x8x16xbf16> to vector<64x16xbf16>
    %18 = vector.extract_strided_slice %1 {offsets = [2, 2, 0], sizes = [8, 8, 16], strides = [1, 1, 1]} : vector<10x10x16xbf16> to vector<8x8x16xbf16>
    %19 = vector.shape_cast %18 : vector<8x8x16xbf16> to vector<64x16xbf16>
    %20 = tpu.concatenate %3, %5, %7, %9, %11, %13, %15, %17, %19 in 1 : vector<64x16xbf16>, vector<64x16xbf16>, vector<64x16xbf16>, vector<64x16xbf16>, vector<64x16xbf16>, vector<64x16xbf16>, vector<64x16xbf16>, vector<64x16xbf16>, vector<64x16xbf16> -> vector<64x144xbf16>
    %c0_3 = arith.constant 0 : index
    %c0_4 = arith.constant 0 : index
    %21 = vector.load %arg2[%c0_3, %c0_4] : memref<144x32xbf16, #tpu.memory_space<vmem>>, vector<144x32xbf16>
    %cst = arith.constant dense<0.000000e+00> : vector<64x32xf32>
    %22 = tpu.matmul %20, %21, %cst {dimension_numbers = #tpu.dot_dimension_numbers<[1], [0], [0], [1], [0, 0, 1, 1], [], []>} : vector<64x144xbf16>, vector<144x32xbf16>, vector<64x32xf32> -> vector<64x32xf32>
    %c0_5 = arith.constant 0 : index
    %c0_6 = arith.constant 0 : index
    %23 = vector.load %arg3[%c0_5, %c0_6] : memref<1x32xf32, #tpu.memory_space<vmem>>, vector<1x32xf32>
    %24 = vector.broadcast %23 : vector<1x32xf32> to vector<64x32xf32>
    %25 = arith.addf %22, %24 : vector<64x32xf32>
    %cst_7 = arith.constant 0.000000e+00 : f32
    %26 = vector.broadcast %cst_7 : f32 to vector<64x32xf32>
    %27 = arith.maximumf %25, %26 : vector<64x32xf32>
    %28 = vector.shape_cast %27 : vector<64x32xf32> to vector<8x8x32xf32>
    %29 = vector.extract_strided_slice %28 {offsets = [0, 0, 0], sizes = [6, 6, 32], strides = [1, 1, 1]} : vector<8x8x32xf32> to vector<6x6x32xf32>
    %30 = vector.extract_strided_slice %28 {offsets = [0, 1, 0], sizes = [6, 6, 32], strides = [1, 1, 1]} : vector<8x8x32xf32> to vector<6x6x32xf32>
    %31 = arith.maximumf %29, %30 : vector<6x6x32xf32>
    %32 = vector.extract_strided_slice %28 {offsets = [0, 2, 0], sizes = [6, 6, 32], strides = [1, 1, 1]} : vector<8x8x32xf32> to vector<6x6x32xf32>
    %33 = arith.maximumf %31, %32 : vector<6x6x32xf32>
    %34 = vector.extract_strided_slice %28 {offsets = [1, 0, 0], sizes = [6, 6, 32], strides = [1, 1, 1]} : vector<8x8x32xf32> to vector<6x6x32xf32>
    %35 = arith.maximumf %33, %34 : vector<6x6x32xf32>
    %36 = vector.extract_strided_slice %28 {offsets = [1, 1, 0], sizes = [6, 6, 32], strides = [1, 1, 1]} : vector<8x8x32xf32> to vector<6x6x32xf32>
    %37 = arith.maximumf %35, %36 : vector<6x6x32xf32>
    %38 = vector.extract_strided_slice %28 {offsets = [1, 2, 0], sizes = [6, 6, 32], strides = [1, 1, 1]} : vector<8x8x32xf32> to vector<6x6x32xf32>
    %39 = arith.maximumf %37, %38 : vector<6x6x32xf32>
    %40 = vector.extract_strided_slice %28 {offsets = [2, 0, 0], sizes = [6, 6, 32], strides = [1, 1, 1]} : vector<8x8x32xf32> to vector<6x6x32xf32>
    %41 = arith.maximumf %39, %40 : vector<6x6x32xf32>
    %42 = vector.extract_strided_slice %28 {offsets = [2, 1, 0], sizes = [6, 6, 32], strides = [1, 1, 1]} : vector<8x8x32xf32> to vector<6x6x32xf32>
    %43 = arith.maximumf %41, %42 : vector<6x6x32xf32>
    %44 = vector.extract_strided_slice %28 {offsets = [2, 2, 0], sizes = [6, 6, 32], strides = [1, 1, 1]} : vector<8x8x32xf32> to vector<6x6x32xf32>
    %45 = arith.maximumf %43, %44 : vector<6x6x32xf32>
    %cst_8 = arith.constant 0.000000e+00 : f32
    %46 = vector.broadcast %cst_8 : f32 to vector<1x6x32xf32>
    %47 = tpu.concatenate %46, %45, %46 in 0 : vector<1x6x32xf32>, vector<6x6x32xf32>, vector<1x6x32xf32> -> vector<8x6x32xf32>
    %cst_9 = arith.constant 0.000000e+00 : f32
    %48 = vector.broadcast %cst_9 : f32 to vector<8x1x32xf32>
    %49 = tpu.concatenate %48, %47, %48 in 1 : vector<8x1x32xf32>, vector<8x6x32xf32>, vector<8x1x32xf32> -> vector<8x8x32xf32>
    %50 = vector.extract_strided_slice %49 {offsets = [0, 0, 0], sizes = [1, 1, 32], strides = [1, 1, 1]} : vector<8x8x32xf32> to vector<1x1x32xf32>
    %51 = vector.shape_cast %50 : vector<1x1x32xf32> to vector<1x32xf32>
    %52 = vector.extract_strided_slice %49 {offsets = [0, 1, 0], sizes = [1, 1, 32], strides = [1, 1, 1]} : vector<8x8x32xf32> to vector<1x1x32xf32>
    %53 = vector.shape_cast %52 : vector<1x1x32xf32> to vector<1x32xf32>
    %54 = vector.extract_strided_slice %49 {offsets = [0, 2, 0], sizes = [1, 1, 32], strides = [1, 1, 1]} : vector<8x8x32xf32> to vector<1x1x32xf32>
    %55 = vector.shape_cast %54 : vector<1x1x32xf32> to vector<1x32xf32>
    %56 = vector.extract_strided_slice %49 {offsets = [1, 0, 0], sizes = [1, 1, 32], strides = [1, 1, 1]} : vector<8x8x32xf32> to vector<1x1x32xf32>
    %57 = vector.shape_cast %56 : vector<1x1x32xf32> to vector<1x32xf32>
    %58 = vector.extract_strided_slice %49 {offsets = [1, 1, 0], sizes = [1, 1, 32], strides = [1, 1, 1]} : vector<8x8x32xf32> to vector<1x1x32xf32>
    %59 = vector.shape_cast %58 : vector<1x1x32xf32> to vector<1x32xf32>
    %60 = vector.extract_strided_slice %49 {offsets = [1, 2, 0], sizes = [1, 1, 32], strides = [1, 1, 1]} : vector<8x8x32xf32> to vector<1x1x32xf32>
    %61 = vector.shape_cast %60 : vector<1x1x32xf32> to vector<1x32xf32>
    %62 = vector.extract_strided_slice %49 {offsets = [2, 0, 0], sizes = [1, 1, 32], strides = [1, 1, 1]} : vector<8x8x32xf32> to vector<1x1x32xf32>
    %63 = vector.shape_cast %62 : vector<1x1x32xf32> to vector<1x32xf32>
    %64 = vector.extract_strided_slice %49 {offsets = [2, 1, 0], sizes = [1, 1, 32], strides = [1, 1, 1]} : vector<8x8x32xf32> to vector<1x1x32xf32>
    %65 = vector.shape_cast %64 : vector<1x1x32xf32> to vector<1x32xf32>
    %66 = vector.extract_strided_slice %49 {offsets = [2, 2, 0], sizes = [1, 1, 32], strides = [1, 1, 1]} : vector<8x8x32xf32> to vector<1x1x32xf32>
    %67 = vector.shape_cast %66 : vector<1x1x32xf32> to vector<1x32xf32>
    %68 = tpu.concatenate %51, %53, %55, %57, %59, %61, %63, %65, %67 in 1 : vector<1x32xf32>, vector<1x32xf32>, vector<1x32xf32>, vector<1x32xf32>, vector<1x32xf32>, vector<1x32xf32>, vector<1x32xf32>, vector<1x32xf32>, vector<1x32xf32> -> vector<1x288xf32>
    %69 = vector.extract_strided_slice %49 {offsets = [0, 2, 0], sizes = [1, 1, 32], strides = [1, 1, 1]} : vector<8x8x32xf32> to vector<1x1x32xf32>
    %70 = vector.shape_cast %69 : vector<1x1x32xf32> to vector<1x32xf32>
    %71 = vector.extract_strided_slice %49 {offsets = [0, 3, 0], sizes = [1, 1, 32], strides = [1, 1, 1]} : vector<8x8x32xf32> to vector<1x1x32xf32>
    %72 = vector.shape_cast %71 : vector<1x1x32xf32> to vector<1x32xf32>
    %73 = vector.extract_strided_slice %49 {offsets = [0, 4, 0], sizes = [1, 1, 32], strides = [1, 1, 1]} : vector<8x8x32xf32> to vector<1x1x32xf32>
    %74 = vector.shape_cast %73 : vector<1x1x32xf32> to vector<1x32xf32>
    %75 = vector.extract_strided_slice %49 {offsets = [1, 2, 0], sizes = [1, 1, 32], strides = [1, 1, 1]} : vector<8x8x32xf32> to vector<1x1x32xf32>
    %76 = vector.shape_cast %75 : vector<1x1x32xf32> to vector<1x32xf32>
    %77 = vector.extract_strided_slice %49 {offsets = [1, 3, 0], sizes = [1, 1, 32], strides = [1, 1, 1]} : vector<8x8x32xf32> to vector<1x1x32xf32>
    %78 = vector.shape_cast %77 : vector<1x1x32xf32> to vector<1x32xf32>
    %79 = vector.extract_strided_slice %49 {offsets = [1, 4, 0], sizes = [1, 1, 32], strides = [1, 1, 1]} : vector<8x8x32xf32> to vector<1x1x32xf32>
    %80 = vector.shape_cast %79 : vector<1x1x32xf32> to vector<1x32xf32>
    %81 = vector.extract_strided_slice %49 {offsets = [2, 2, 0], sizes = [1, 1, 32], strides = [1, 1, 1]} : vector<8x8x32xf32> to vector<1x1x32xf32>
    %82 = vector.shape_cast %81 : vector<1x1x32xf32> to vector<1x32xf32>
    %83 = vector.extract_strided_slice %49 {offsets = [2, 3, 0], sizes = [1, 1, 32], strides = [1, 1, 1]} : vector<8x8x32xf32> to vector<1x1x32xf32>
    %84 = vector.shape_cast %83 : vector<1x1x32xf32> to vector<1x32xf32>
    %85 = vector.extract_strided_slice %49 {offsets = [2, 4, 0], sizes = [1, 1, 32], strides = [1, 1, 1]} : vector<8x8x32xf32> to vector<1x1x32xf32>
    %86 = vector.shape_cast %85 : vector<1x1x32xf32> to vector<1x32xf32>
    %87 = tpu.concatenate %70, %72, %74, %76, %78, %80, %82, %84, %86 in 1 : vector<1x32xf32>, vector<1x32xf32>, vector<1x32xf32>, vector<1x32xf32>, vector<1x32xf32>, vector<1x32xf32>, vector<1x32xf32>, vector<1x32xf32>, vector<1x32xf32> -> vector<1x288xf32>
    %88 = vector.extract_strided_slice %49 {offsets = [0, 4, 0], sizes = [1, 1, 32], strides = [1, 1, 1]} : vector<8x8x32xf32> to vector<1x1x32xf32>
    %89 = vector.shape_cast %88 : vector<1x1x32xf32> to vector<1x32xf32>
    %90 = vector.extract_strided_slice %49 {offsets = [0, 5, 0], sizes = [1, 1, 32], strides = [1, 1, 1]} : vector<8x8x32xf32> to vector<1x1x32xf32>
    %91 = vector.shape_cast %90 : vector<1x1x32xf32> to vector<1x32xf32>
    %92 = vector.extract_strided_slice %49 {offsets = [0, 6, 0], sizes = [1, 1, 32], strides = [1, 1, 1]} : vector<8x8x32xf32> to vector<1x1x32xf32>
    %93 = vector.shape_cast %92 : vector<1x1x32xf32> to vector<1x32xf32>
    %94 = vector.extract_strided_slice %49 {offsets = [1, 4, 0], sizes = [1, 1, 32], strides = [1, 1, 1]} : vector<8x8x32xf32> to vector<1x1x32xf32>
    %95 = vector.shape_cast %94 : vector<1x1x32xf32> to vector<1x32xf32>
    %96 = vector.extract_strided_slice %49 {offsets = [1, 5, 0], sizes = [1, 1, 32], strides = [1, 1, 1]} : vector<8x8x32xf32> to vector<1x1x32xf32>
    %97 = vector.shape_cast %96 : vector<1x1x32xf32> to vector<1x32xf32>
    %98 = vector.extract_strided_slice %49 {offsets = [1, 6, 0], sizes = [1, 1, 32], strides = [1, 1, 1]} : vector<8x8x32xf32> to vector<1x1x32xf32>
    %99 = vector.shape_cast %98 : vector<1x1x32xf32> to vector<1x32xf32>
    %100 = vector.extract_strided_slice %49 {offsets = [2, 4, 0], sizes = [1, 1, 32], strides = [1, 1, 1]} : vector<8x8x32xf32> to vector<1x1x32xf32>
    %101 = vector.shape_cast %100 : vector<1x1x32xf32> to vector<1x32xf32>
    %102 = vector.extract_strided_slice %49 {offsets = [2, 5, 0], sizes = [1, 1, 32], strides = [1, 1, 1]} : vector<8x8x32xf32> to vector<1x1x32xf32>
    %103 = vector.shape_cast %102 : vector<1x1x32xf32> to vector<1x32xf32>
    %104 = vector.extract_strided_slice %49 {offsets = [2, 6, 0], sizes = [1, 1, 32], strides = [1, 1, 1]} : vector<8x8x32xf32> to vector<1x1x32xf32>
    %105 = vector.shape_cast %104 : vector<1x1x32xf32> to vector<1x32xf32>
    %106 = tpu.concatenate %89, %91, %93, %95, %97, %99, %101, %103, %105 in 1 : vector<1x32xf32>, vector<1x32xf32>, vector<1x32xf32>, vector<1x32xf32>, vector<1x32xf32>, vector<1x32xf32>, vector<1x32xf32>, vector<1x32xf32>, vector<1x32xf32> -> vector<1x288xf32>
    %107 = vector.extract_strided_slice %49 {offsets = [2, 0, 0], sizes = [1, 1, 32], strides = [1, 1, 1]} : vector<8x8x32xf32> to vector<1x1x32xf32>
    %108 = vector.shape_cast %107 : vector<1x1x32xf32> to vector<1x32xf32>
    %109 = vector.extract_strided_slice %49 {offsets = [2, 1, 0], sizes = [1, 1, 32], strides = [1, 1, 1]} : vector<8x8x32xf32> to vector<1x1x32xf32>
    %110 = vector.shape_cast %109 : vector<1x1x32xf32> to vector<1x32xf32>
    %111 = vector.extract_strided_slice %49 {offsets = [2, 2, 0], sizes = [1, 1, 32], strides = [1, 1, 1]} : vector<8x8x32xf32> to vector<1x1x32xf32>
    %112 = vector.shape_cast %111 : vector<1x1x32xf32> to vector<1x32xf32>
    %113 = vector.extract_strided_slice %49 {offsets = [3, 0, 0], sizes = [1, 1, 32], strides = [1, 1, 1]} : vector<8x8x32xf32> to vector<1x1x32xf32>
    %114 = vector.shape_cast %113 : vector<1x1x32xf32> to vector<1x32xf32>
    %115 = vector.extract_strided_slice %49 {offsets = [3, 1, 0], sizes = [1, 1, 32], strides = [1, 1, 1]} : vector<8x8x32xf32> to vector<1x1x32xf32>
    %116 = vector.shape_cast %115 : vector<1x1x32xf32> to vector<1x32xf32>
    %117 = vector.extract_strided_slice %49 {offsets = [3, 2, 0], sizes = [1, 1, 32], strides = [1, 1, 1]} : vector<8x8x32xf32> to vector<1x1x32xf32>
    %118 = vector.shape_cast %117 : vector<1x1x32xf32> to vector<1x32xf32>
    %119 = vector.extract_strided_slice %49 {offsets = [4, 0, 0], sizes = [1, 1, 32], strides = [1, 1, 1]} : vector<8x8x32xf32> to vector<1x1x32xf32>
    %120 = vector.shape_cast %119 : vector<1x1x32xf32> to vector<1x32xf32>
    %121 = vector.extract_strided_slice %49 {offsets = [4, 1, 0], sizes = [1, 1, 32], strides = [1, 1, 1]} : vector<8x8x32xf32> to vector<1x1x32xf32>
    %122 = vector.shape_cast %121 : vector<1x1x32xf32> to vector<1x32xf32>
    %123 = vector.extract_strided_slice %49 {offsets = [4, 2, 0], sizes = [1, 1, 32], strides = [1, 1, 1]} : vector<8x8x32xf32> to vector<1x1x32xf32>
    %124 = vector.shape_cast %123 : vector<1x1x32xf32> to vector<1x32xf32>
    %125 = tpu.concatenate %108, %110, %112, %114, %116, %118, %120, %122, %124 in 1 : vector<1x32xf32>, vector<1x32xf32>, vector<1x32xf32>, vector<1x32xf32>, vector<1x32xf32>, vector<1x32xf32>, vector<1x32xf32>, vector<1x32xf32>, vector<1x32xf32> -> vector<1x288xf32>
    %126 = vector.extract_strided_slice %49 {offsets = [2, 2, 0], sizes = [1, 1, 32], strides = [1, 1, 1]} : vector<8x8x32xf32> to vector<1x1x32xf32>
    %127 = vector.shape_cast %126 : vector<1x1x32xf32> to vector<1x32xf32>
    %128 = vector.extract_strided_slice %49 {offsets = [2, 3, 0], sizes = [1, 1, 32], strides = [1, 1, 1]} : vector<8x8x32xf32> to vector<1x1x32xf32>
    %129 = vector.shape_cast %128 : vector<1x1x32xf32> to vector<1x32xf32>
    %130 = vector.extract_strided_slice %49 {offsets = [2, 4, 0], sizes = [1, 1, 32], strides = [1, 1, 1]} : vector<8x8x32xf32> to vector<1x1x32xf32>
    %131 = vector.shape_cast %130 : vector<1x1x32xf32> to vector<1x32xf32>
    %132 = vector.extract_strided_slice %49 {offsets = [3, 2, 0], sizes = [1, 1, 32], strides = [1, 1, 1]} : vector<8x8x32xf32> to vector<1x1x32xf32>
    %133 = vector.shape_cast %132 : vector<1x1x32xf32> to vector<1x32xf32>
    %134 = vector.extract_strided_slice %49 {offsets = [3, 3, 0], sizes = [1, 1, 32], strides = [1, 1, 1]} : vector<8x8x32xf32> to vector<1x1x32xf32>
    %135 = vector.shape_cast %134 : vector<1x1x32xf32> to vector<1x32xf32>
    %136 = vector.extract_strided_slice %49 {offsets = [3, 4, 0], sizes = [1, 1, 32], strides = [1, 1, 1]} : vector<8x8x32xf32> to vector<1x1x32xf32>
    %137 = vector.shape_cast %136 : vector<1x1x32xf32> to vector<1x32xf32>
    %138 = vector.extract_strided_slice %49 {offsets = [4, 2, 0], sizes = [1, 1, 32], strides = [1, 1, 1]} : vector<8x8x32xf32> to vector<1x1x32xf32>
    %139 = vector.shape_cast %138 : vector<1x1x32xf32> to vector<1x32xf32>
    %140 = vector.extract_strided_slice %49 {offsets = [4, 3, 0], sizes = [1, 1, 32], strides = [1, 1, 1]} : vector<8x8x32xf32> to vector<1x1x32xf32>
    %141 = vector.shape_cast %140 : vector<1x1x32xf32> to vector<1x32xf32>
    %142 = vector.extract_strided_slice %49 {offsets = [4, 4, 0], sizes = [1, 1, 32], strides = [1, 1, 1]} : vector<8x8x32xf32> to vector<1x1x32xf32>
    %143 = vector.shape_cast %142 : vector<1x1x32xf32> to vector<1x32xf32>
    %144 = tpu.concatenate %127, %129, %131, %133, %135, %137, %139, %141, %143 in 1 : vector<1x32xf32>, vector<1x32xf32>, vector<1x32xf32>, vector<1x32xf32>, vector<1x32xf32>, vector<1x32xf32>, vector<1x32xf32>, vector<1x32xf32>, vector<1x32xf32> -> vector<1x288xf32>
    %145 = vector.extract_strided_slice %49 {offsets = [2, 4, 0], sizes = [1, 1, 32], strides = [1, 1, 1]} : vector<8x8x32xf32> to vector<1x1x32xf32>
    %146 = vector.shape_cast %145 : vector<1x1x32xf32> to vector<1x32xf32>
    %147 = vector.extract_strided_slice %49 {offsets = [2, 5, 0], sizes = [1, 1, 32], strides = [1, 1, 1]} : vector<8x8x32xf32> to vector<1x1x32xf32>
    %148 = vector.shape_cast %147 : vector<1x1x32xf32> to vector<1x32xf32>
    %149 = vector.extract_strided_slice %49 {offsets = [2, 6, 0], sizes = [1, 1, 32], strides = [1, 1, 1]} : vector<8x8x32xf32> to vector<1x1x32xf32>
    %150 = vector.shape_cast %149 : vector<1x1x32xf32> to vector<1x32xf32>
    %151 = vector.extract_strided_slice %49 {offsets = [3, 4, 0], sizes = [1, 1, 32], strides = [1, 1, 1]} : vector<8x8x32xf32> to vector<1x1x32xf32>
    %152 = vector.shape_cast %151 : vector<1x1x32xf32> to vector<1x32xf32>
    %153 = vector.extract_strided_slice %49 {offsets = [3, 5, 0], sizes = [1, 1, 32], strides = [1, 1, 1]} : vector<8x8x32xf32> to vector<1x1x32xf32>
    %154 = vector.shape_cast %153 : vector<1x1x32xf32> to vector<1x32xf32>
    %155 = vector.extract_strided_slice %49 {offsets = [3, 6, 0], sizes = [1, 1, 32], strides = [1, 1, 1]} : vector<8x8x32xf32> to vector<1x1x32xf32>
    %156 = vector.shape_cast %155 : vector<1x1x32xf32> to vector<1x32xf32>
    %157 = vector.extract_strided_slice %49 {offsets = [4, 4, 0], sizes = [1, 1, 32], strides = [1, 1, 1]} : vector<8x8x32xf32> to vector<1x1x32xf32>
    %158 = vector.shape_cast %157 : vector<1x1x32xf32> to vector<1x32xf32>
    %159 = vector.extract_strided_slice %49 {offsets = [4, 5, 0], sizes = [1, 1, 32], strides = [1, 1, 1]} : vector<8x8x32xf32> to vector<1x1x32xf32>
    %160 = vector.shape_cast %159 : vector<1x1x32xf32> to vector<1x32xf32>
    %161 = vector.extract_strided_slice %49 {offsets = [4, 6, 0], sizes = [1, 1, 32], strides = [1, 1, 1]} : vector<8x8x32xf32> to vector<1x1x32xf32>
    %162 = vector.shape_cast %161 : vector<1x1x32xf32> to vector<1x32xf32>
    %163 = tpu.concatenate %146, %148, %150, %152, %154, %156, %158, %160, %162 in 1 : vector<1x32xf32>, vector<1x32xf32>, vector<1x32xf32>, vector<1x32xf32>, vector<1x32xf32>, vector<1x32xf32>, vector<1x32xf32>, vector<1x32xf32>, vector<1x32xf32> -> vector<1x288xf32>
    %164 = vector.extract_strided_slice %49 {offsets = [4, 0, 0], sizes = [1, 1, 32], strides = [1, 1, 1]} : vector<8x8x32xf32> to vector<1x1x32xf32>
    %165 = vector.shape_cast %164 : vector<1x1x32xf32> to vector<1x32xf32>
    %166 = vector.extract_strided_slice %49 {offsets = [4, 1, 0], sizes = [1, 1, 32], strides = [1, 1, 1]} : vector<8x8x32xf32> to vector<1x1x32xf32>
    %167 = vector.shape_cast %166 : vector<1x1x32xf32> to vector<1x32xf32>
    %168 = vector.extract_strided_slice %49 {offsets = [4, 2, 0], sizes = [1, 1, 32], strides = [1, 1, 1]} : vector<8x8x32xf32> to vector<1x1x32xf32>
    %169 = vector.shape_cast %168 : vector<1x1x32xf32> to vector<1x32xf32>
    %170 = vector.extract_strided_slice %49 {offsets = [5, 0, 0], sizes = [1, 1, 32], strides = [1, 1, 1]} : vector<8x8x32xf32> to vector<1x1x32xf32>
    %171 = vector.shape_cast %170 : vector<1x1x32xf32> to vector<1x32xf32>
    %172 = vector.extract_strided_slice %49 {offsets = [5, 1, 0], sizes = [1, 1, 32], strides = [1, 1, 1]} : vector<8x8x32xf32> to vector<1x1x32xf32>
    %173 = vector.shape_cast %172 : vector<1x1x32xf32> to vector<1x32xf32>
    %174 = vector.extract_strided_slice %49 {offsets = [5, 2, 0], sizes = [1, 1, 32], strides = [1, 1, 1]} : vector<8x8x32xf32> to vector<1x1x32xf32>
    %175 = vector.shape_cast %174 : vector<1x1x32xf32> to vector<1x32xf32>
    %176 = vector.extract_strided_slice %49 {offsets = [6, 0, 0], sizes = [1, 1, 32], strides = [1, 1, 1]} : vector<8x8x32xf32> to vector<1x1x32xf32>
    %177 = vector.shape_cast %176 : vector<1x1x32xf32> to vector<1x32xf32>
    %178 = vector.extract_strided_slice %49 {offsets = [6, 1, 0], sizes = [1, 1, 32], strides = [1, 1, 1]} : vector<8x8x32xf32> to vector<1x1x32xf32>
    %179 = vector.shape_cast %178 : vector<1x1x32xf32> to vector<1x32xf32>
    %180 = vector.extract_strided_slice %49 {offsets = [6, 2, 0], sizes = [1, 1, 32], strides = [1, 1, 1]} : vector<8x8x32xf32> to vector<1x1x32xf32>
    %181 = vector.shape_cast %180 : vector<1x1x32xf32> to vector<1x32xf32>
    %182 = tpu.concatenate %165, %167, %169, %171, %173, %175, %177, %179, %181 in 1 : vector<1x32xf32>, vector<1x32xf32>, vector<1x32xf32>, vector<1x32xf32>, vector<1x32xf32>, vector<1x32xf32>, vector<1x32xf32>, vector<1x32xf32>, vector<1x32xf32> -> vector<1x288xf32>
    %183 = vector.extract_strided_slice %49 {offsets = [4, 2, 0], sizes = [1, 1, 32], strides = [1, 1, 1]} : vector<8x8x32xf32> to vector<1x1x32xf32>
    %184 = vector.shape_cast %183 : vector<1x1x32xf32> to vector<1x32xf32>
    %185 = vector.extract_strided_slice %49 {offsets = [4, 3, 0], sizes = [1, 1, 32], strides = [1, 1, 1]} : vector<8x8x32xf32> to vector<1x1x32xf32>
    %186 = vector.shape_cast %185 : vector<1x1x32xf32> to vector<1x32xf32>
    %187 = vector.extract_strided_slice %49 {offsets = [4, 4, 0], sizes = [1, 1, 32], strides = [1, 1, 1]} : vector<8x8x32xf32> to vector<1x1x32xf32>
    %188 = vector.shape_cast %187 : vector<1x1x32xf32> to vector<1x32xf32>
    %189 = vector.extract_strided_slice %49 {offsets = [5, 2, 0], sizes = [1, 1, 32], strides = [1, 1, 1]} : vector<8x8x32xf32> to vector<1x1x32xf32>
    %190 = vector.shape_cast %189 : vector<1x1x32xf32> to vector<1x32xf32>
    %191 = vector.extract_strided_slice %49 {offsets = [5, 3, 0], sizes = [1, 1, 32], strides = [1, 1, 1]} : vector<8x8x32xf32> to vector<1x1x32xf32>
    %192 = vector.shape_cast %191 : vector<1x1x32xf32> to vector<1x32xf32>
    %193 = vector.extract_strided_slice %49 {offsets = [5, 4, 0], sizes = [1, 1, 32], strides = [1, 1, 1]} : vector<8x8x32xf32> to vector<1x1x32xf32>
    %194 = vector.shape_cast %193 : vector<1x1x32xf32> to vector<1x32xf32>
    %195 = vector.extract_strided_slice %49 {offsets = [6, 2, 0], sizes = [1, 1, 32], strides = [1, 1, 1]} : vector<8x8x32xf32> to vector<1x1x32xf32>
    %196 = vector.shape_cast %195 : vector<1x1x32xf32> to vector<1x32xf32>
    %197 = vector.extract_strided_slice %49 {offsets = [6, 3, 0], sizes = [1, 1, 32], strides = [1, 1, 1]} : vector<8x8x32xf32> to vector<1x1x32xf32>
    %198 = vector.shape_cast %197 : vector<1x1x32xf32> to vector<1x32xf32>
    %199 = vector.extract_strided_slice %49 {offsets = [6, 4, 0], sizes = [1, 1, 32], strides = [1, 1, 1]} : vector<8x8x32xf32> to vector<1x1x32xf32>
    %200 = vector.shape_cast %199 : vector<1x1x32xf32> to vector<1x32xf32>
    %201 = tpu.concatenate %184, %186, %188, %190, %192, %194, %196, %198, %200 in 1 : vector<1x32xf32>, vector<1x32xf32>, vector<1x32xf32>, vector<1x32xf32>, vector<1x32xf32>, vector<1x32xf32>, vector<1x32xf32>, vector<1x32xf32>, vector<1x32xf32> -> vector<1x288xf32>
    %202 = vector.extract_strided_slice %49 {offsets = [4, 4, 0], sizes = [1, 1, 32], strides = [1, 1, 1]} : vector<8x8x32xf32> to vector<1x1x32xf32>
    %203 = vector.shape_cast %202 : vector<1x1x32xf32> to vector<1x32xf32>
    %204 = vector.extract_strided_slice %49 {offsets = [4, 5, 0], sizes = [1, 1, 32], strides = [1, 1, 1]} : vector<8x8x32xf32> to vector<1x1x32xf32>
    %205 = vector.shape_cast %204 : vector<1x1x32xf32> to vector<1x32xf32>
    %206 = vector.extract_strided_slice %49 {offsets = [4, 6, 0], sizes = [1, 1, 32], strides = [1, 1, 1]} : vector<8x8x32xf32> to vector<1x1x32xf32>
    %207 = vector.shape_cast %206 : vector<1x1x32xf32> to vector<1x32xf32>
    %208 = vector.extract_strided_slice %49 {offsets = [5, 4, 0], sizes = [1, 1, 32], strides = [1, 1, 1]} : vector<8x8x32xf32> to vector<1x1x32xf32>
    %209 = vector.shape_cast %208 : vector<1x1x32xf32> to vector<1x32xf32>
    %210 = vector.extract_strided_slice %49 {offsets = [5, 5, 0], sizes = [1, 1, 32], strides = [1, 1, 1]} : vector<8x8x32xf32> to vector<1x1x32xf32>
    %211 = vector.shape_cast %210 : vector<1x1x32xf32> to vector<1x32xf32>
    %212 = vector.extract_strided_slice %49 {offsets = [5, 6, 0], sizes = [1, 1, 32], strides = [1, 1, 1]} : vector<8x8x32xf32> to vector<1x1x32xf32>
    %213 = vector.shape_cast %212 : vector<1x1x32xf32> to vector<1x32xf32>
    %214 = vector.extract_strided_slice %49 {offsets = [6, 4, 0], sizes = [1, 1, 32], strides = [1, 1, 1]} : vector<8x8x32xf32> to vector<1x1x32xf32>
    %215 = vector.shape_cast %214 : vector<1x1x32xf32> to vector<1x32xf32>
    %216 = vector.extract_strided_slice %49 {offsets = [6, 5, 0], sizes = [1, 1, 32], strides = [1, 1, 1]} : vector<8x8x32xf32> to vector<1x1x32xf32>
    %217 = vector.shape_cast %216 : vector<1x1x32xf32> to vector<1x32xf32>
    %218 = vector.extract_strided_slice %49 {offsets = [6, 6, 0], sizes = [1, 1, 32], strides = [1, 1, 1]} : vector<8x8x32xf32> to vector<1x1x32xf32>
    %219 = vector.shape_cast %218 : vector<1x1x32xf32> to vector<1x32xf32>
    %220 = tpu.concatenate %203, %205, %207, %209, %211, %213, %215, %217, %219 in 1 : vector<1x32xf32>, vector<1x32xf32>, vector<1x32xf32>, vector<1x32xf32>, vector<1x32xf32>, vector<1x32xf32>, vector<1x32xf32>, vector<1x32xf32>, vector<1x32xf32> -> vector<1x288xf32>
    %221 = tpu.concatenate %68, %87, %106, %125, %144, %163, %182, %201, %220 in 0 : vector<1x288xf32>, vector<1x288xf32>, vector<1x288xf32>, vector<1x288xf32>, vector<1x288xf32>, vector<1x288xf32>, vector<1x288xf32>, vector<1x288xf32>, vector<1x288xf32> -> vector<9x288xf32>
    %222 = arith.truncf %221 : vector<9x288xf32> to vector<9x288xbf16>
    %c0_10 = arith.constant 0 : index
    %c0_11 = arith.constant 0 : index
    %223 = vector.load %arg4[%c0_10, %c0_11] : memref<288x64xbf16, #tpu.memory_space<vmem>>, vector<288x64xbf16>
    %cst_12 = arith.constant dense<0.000000e+00> : vector<9x64xf32>
    %224 = tpu.matmul %222, %223, %cst_12 {dimension_numbers = #tpu.dot_dimension_numbers<[1], [0], [0], [1], [0, 0, 1, 1], [], []>} : vector<9x288xbf16>, vector<288x64xbf16>, vector<9x64xf32> -> vector<9x64xf32>
    %c0_13 = arith.constant 0 : index
    %c0_14 = arith.constant 0 : index
    %225 = vector.load %arg5[%c0_13, %c0_14] : memref<1x64xf32, #tpu.memory_space<vmem>>, vector<1x64xf32>
    %226 = vector.broadcast %225 : vector<1x64xf32> to vector<9x64xf32>
    %227 = arith.addf %224, %226 : vector<9x64xf32>
    %cst_15 = arith.constant 0.000000e+00 : f32
    %228 = vector.broadcast %cst_15 : f32 to vector<9x64xf32>
    %229 = arith.maximumf %227, %228 : vector<9x64xf32>
    %230 = vector.extract_strided_slice %229 {offsets = [0, 0], sizes = [1, 64], strides = [1, 1]} : vector<9x64xf32> to vector<1x64xf32>
    %231 = vector.extract_strided_slice %229 {offsets = [1, 0], sizes = [1, 64], strides = [1, 1]} : vector<9x64xf32> to vector<1x64xf32>
    %232 = arith.addf %230, %231 : vector<1x64xf32>
    %233 = vector.extract_strided_slice %229 {offsets = [3, 0], sizes = [1, 64], strides = [1, 1]} : vector<9x64xf32> to vector<1x64xf32>
    %234 = arith.addf %232, %233 : vector<1x64xf32>
    %235 = vector.extract_strided_slice %229 {offsets = [4, 0], sizes = [1, 64], strides = [1, 1]} : vector<9x64xf32> to vector<1x64xf32>
    %236 = arith.addf %234, %235 : vector<1x64xf32>
    %cst_16 = arith.constant 2.500000e-01 : f32
    %237 = vector.broadcast %cst_16 : f32 to vector<1x64xf32>
    %238 = arith.mulf %236, %237 : vector<1x64xf32>
    %239 = vector.extract_strided_slice %229 {offsets = [1, 0], sizes = [1, 64], strides = [1, 1]} : vector<9x64xf32> to vector<1x64xf32>
    %240 = vector.extract_strided_slice %229 {offsets = [2, 0], sizes = [1, 64], strides = [1, 1]} : vector<9x64xf32> to vector<1x64xf32>
    %241 = arith.addf %239, %240 : vector<1x64xf32>
    %242 = vector.extract_strided_slice %229 {offsets = [4, 0], sizes = [1, 64], strides = [1, 1]} : vector<9x64xf32> to vector<1x64xf32>
    %243 = arith.addf %241, %242 : vector<1x64xf32>
    %244 = vector.extract_strided_slice %229 {offsets = [5, 0], sizes = [1, 64], strides = [1, 1]} : vector<9x64xf32> to vector<1x64xf32>
    %245 = arith.addf %243, %244 : vector<1x64xf32>
    %cst_17 = arith.constant 2.500000e-01 : f32
    %246 = vector.broadcast %cst_17 : f32 to vector<1x64xf32>
    %247 = arith.mulf %245, %246 : vector<1x64xf32>
    %248 = vector.extract_strided_slice %229 {offsets = [3, 0], sizes = [1, 64], strides = [1, 1]} : vector<9x64xf32> to vector<1x64xf32>
    %249 = vector.extract_strided_slice %229 {offsets = [4, 0], sizes = [1, 64], strides = [1, 1]} : vector<9x64xf32> to vector<1x64xf32>
    %250 = arith.addf %248, %249 : vector<1x64xf32>
    %251 = vector.extract_strided_slice %229 {offsets = [6, 0], sizes = [1, 64], strides = [1, 1]} : vector<9x64xf32> to vector<1x64xf32>
    %252 = arith.addf %250, %251 : vector<1x64xf32>
    %253 = vector.extract_strided_slice %229 {offsets = [7, 0], sizes = [1, 64], strides = [1, 1]} : vector<9x64xf32> to vector<1x64xf32>
    %254 = arith.addf %252, %253 : vector<1x64xf32>
    %cst_18 = arith.constant 2.500000e-01 : f32
    %255 = vector.broadcast %cst_18 : f32 to vector<1x64xf32>
    %256 = arith.mulf %254, %255 : vector<1x64xf32>
    %257 = vector.extract_strided_slice %229 {offsets = [4, 0], sizes = [1, 64], strides = [1, 1]} : vector<9x64xf32> to vector<1x64xf32>
    %258 = vector.extract_strided_slice %229 {offsets = [5, 0], sizes = [1, 64], strides = [1, 1]} : vector<9x64xf32> to vector<1x64xf32>
    %259 = arith.addf %257, %258 : vector<1x64xf32>
    %260 = vector.extract_strided_slice %229 {offsets = [7, 0], sizes = [1, 64], strides = [1, 1]} : vector<9x64xf32> to vector<1x64xf32>
    %261 = arith.addf %259, %260 : vector<1x64xf32>
    %262 = vector.extract_strided_slice %229 {offsets = [8, 0], sizes = [1, 64], strides = [1, 1]} : vector<9x64xf32> to vector<1x64xf32>
    %263 = arith.addf %261, %262 : vector<1x64xf32>
    %cst_19 = arith.constant 2.500000e-01 : f32
    %264 = vector.broadcast %cst_19 : f32 to vector<1x64xf32>
    %265 = arith.mulf %263, %264 : vector<1x64xf32>
    %266 = tpu.concatenate %238, %247, %256, %265 in 1 : vector<1x64xf32>, vector<1x64xf32>, vector<1x64xf32>, vector<1x64xf32> -> vector<1x256xf32>
    %267 = arith.truncf %266 : vector<1x256xf32> to vector<1x256xbf16>
    %c0_20 = arith.constant 0 : index
    %c0_21 = arith.constant 0 : index
    %268 = vector.load %arg6[%c0_20, %c0_21] : memref<256x128xbf16, #tpu.memory_space<vmem>>, vector<256x128xbf16>
    %cst_22 = arith.constant dense<0.000000e+00> : vector<1x128xf32>
    %269 = tpu.matmul %267, %268, %cst_22 {dimension_numbers = #tpu.dot_dimension_numbers<[1], [0], [0], [1], [0, 0, 1, 1], [], []>} : vector<1x256xbf16>, vector<256x128xbf16>, vector<1x128xf32> -> vector<1x128xf32>
    %c0_23 = arith.constant 0 : index
    %c0_24 = arith.constant 0 : index
    %270 = vector.load %arg7[%c0_23, %c0_24] : memref<1x128xf32, #tpu.memory_space<vmem>>, vector<1x128xf32>
    %271 = arith.addf %269, %270 : vector<1x128xf32>
    %c0_25 = arith.constant 0 : index
    %c0_26 = arith.constant 0 : index
    %c0_27 = arith.constant 0 : index
    %272 = vector.load %arg8[%c0_25, %c0_26, %c0_27] : memref<1x1x128xf32, #tpu.memory_space<vmem>>, vector<1x1x128xf32>
    %273 = vector.shape_cast %272 : vector<1x1x128xf32> to vector<1x128xf32>
    %274 = vector.shape_cast %271 : vector<1x128xf32> to vector<1x1x128xf32>
    tpu.vector_store %arg8[%c0_25, %c0_26, %c0_27], %274 {strides = array<i32>} : memref<1x1x128xf32, #tpu.memory_space<vmem>>, vector<1x1x128xf32>,
    return
  }
  func.func @transform_0(%arg0: i32) -> (i32, i32, i32, i32) {
    %c0_i32 = arith.constant 0 : i32
    %c0_i32_0 = arith.constant 0 : i32
    %c0_i32_1 = arith.constant 0 : i32
    %c0_i32_2 = arith.constant 0 : i32
    return %arg0, %c0_i32, %c0_i32_0, %c0_i32_1 : i32, i32, i32, i32
  }
  func.func @transform_1(%arg0: i32) -> (i32, i32) {
    %c0_i32 = arith.constant 0 : i32
    %c0_i32_0 = arith.constant 0 : i32
    %c0_i32_1 = arith.constant 0 : i32
    return %c0_i32, %c0_i32_0 : i32, i32
  }
  func.func @transform_2(%arg0: i32) -> (i32, i32) {
    %c0_i32 = arith.constant 0 : i32
    %c0_i32_0 = arith.constant 0 : i32
    %c0_i32_1 = arith.constant 0 : i32
    return %c0_i32, %c0_i32_0 : i32, i32
  }
  func.func @transform_3(%arg0: i32) -> (i32, i32) {
    %c0_i32 = arith.constant 0 : i32
    %c0_i32_0 = arith.constant 0 : i32
    %c0_i32_1 = arith.constant 0 : i32
    return %c0_i32, %c0_i32_0 : i32, i32
  }
  func.func @transform_4(%arg0: i32) -> (i32, i32) {
    %c0_i32 = arith.constant 0 : i32
    %c0_i32_0 = arith.constant 0 : i32
    %c0_i32_1 = arith.constant 0 : i32
    return %c0_i32, %c0_i32_0 : i32, i32
  }
  func.func @transform_5(%arg0: i32) -> (i32, i32) {
    %c0_i32 = arith.constant 0 : i32
    %c0_i32_0 = arith.constant 0 : i32
    %c0_i32_1 = arith.constant 0 : i32
    return %c0_i32, %c0_i32_0 : i32, i32
  }
  func.func @transform_6(%arg0: i32) -> (i32, i32) {
    %c0_i32 = arith.constant 0 : i32
    %c0_i32_0 = arith.constant 0 : i32
    %c0_i32_1 = arith.constant 0 : i32
    return %c0_i32, %c0_i32_0 : i32, i32
  }
  func.func @transform_7(%arg0: i32) -> (i32, i32, i32) {
    %c0_i32 = arith.constant 0 : i32
    %c0_i32_0 = arith.constant 0 : i32
    %c0_i32_1 = arith.constant 0 : i32
    return %arg0, %c0_i32, %c0_i32_0 : i32, i32, i32
  }
}

</mosaic_0001>

<bundles_post_ra>
// kernel: classifier_forward.1
= control target key start
LH: loop header
LB: loop body
LE: loop exit
PB: predicated region body
PF: predicated region fallthrough
CT: control target
= control target key end

     0   :  { %12 = vsyncpa [#allocation3], 0  ;;  %s2674_s0 = inlined_call_operand.vmem [shape: bf16[2,10,10,16], index: 0, kind: input, shape index: {}]   ;;  %s2675_s1 = inlined_call_operand.vmem [shape: bf16[144,32], index: 1, kind: input, shape index: {}]   ;;  %s2676_s2 = inlined_call_operand.vmem [shape: f32[1,32], index: 2, kind: input, shape index: {}]   ;;  %s2677_s3 = inlined_call_operand.vmem [shape: bf16[288,64], index: 3, kind: input, shape index: {}]   ;;  %s2678_s4 = inlined_call_operand.vmem [shape: f32[1,64], index: 4, kind: input, shape index: {}]   ;;  %s2679_s5 = inlined_call_operand.vmem [shape: bf16[256,128], index: 5, kind: input, shape index: {}]   ;;  %s2680_s6 = inlined_call_operand.vmem [shape: f32[1,128], index: 6, kind: input, shape index: {}]   ;;  %s2681_s7 = inlined_call_operand.hbm [shape: f32[2,1,128], index: 7, kind: output, shape index: {}]  }
   0x1   :  { %14 = vsyncpa [#allocation3 + $0x1], 0  ;;  %s2079_s24 = smov 0   ;;  %s2081_s25 = smov 0  }
   0x2   :  { %s2083_s26 = smov 0   ;;  %s2085_s27 = smov 0  }
   0x3 LB: > { %s2100_s28 = sadd.s32 4294967295, %s2026_s27   ;;  %s1664_s29 = sadd.s32 4294967294, %s2026_s27   ;;  %s2026_s27 = sphi %s2085_s27, %s2691_s27   ;;  %s2022_s26 = sphi %s2083_s26, %s2690_s26   ;;  %s2018_s25 = sphi %s2081_s25, %s2689_s25   ;;  %s2014_s24 = sphi %s2079_s24, %s2688_s24  }
   0x4   : > { %s2104_s30 = sadd.s32 1, %s2026_s27   ;;  %s179_s8 = sadd.s32 1, %s2022_s26 }
   0x5   : > { %s176_s9 = ssub.s32 %s2026_s27, %s2104_s30  ;;  %p189_p0 = scmp.ne.s32.totalorder %s2022_s26, %s2018_s25 }
   0x6   : > { %p177_p1 = scmp.eq.s32.totalorder %s176_s9, 0  ;;  %p190_p2 = scmp.eq.s32.totalorder %s2100_s28, 1 }
   0x7   : > { %p195_p3 = scmp.ne.s32.totalorder %s2018_s25, %s2014_s24  ;;  %p196_p4 = scmp.eq.s32.totalorder %s1664_s29, 1 }
   0x8   : > { %s2115_s10 = scalar_select %p177_p1, %s2022_s26, %s179_s8  }
   0x9   : > { %p2117_p5 = por %p190_p2, %p189_p0  ;;  %p2121_p6 = por %p196_p4, %p195_p3 }
   0xa   : > { %p1667_p7 = scmp.ge.s32.totalorder %s2026_s27, 1  ;;  %p240_p8 = scmp.lt.s32.totalorder %s2026_s27, 3 }
   0xc   : > { %p241_p9 = pnand %p1667_p7, %p240_p8 }
   0xd   : > { %p271_p10 = scmp.lt.s32.totalorder (!%p241_p9), %s2100_s28, 1  ;;  %s2029_s29 = smov (!%p241_p9), 48  }
   0xe   : > { %244 = sbr.rel (%p241_p9) target bundleno = 1095 (0x447), region = 48  ;;  %s2030_s13 = smov (!%p241_p9), 96  }
   0xf   : > { %s2031_s14 = smov (!%p241_p9), 32   ;;  %s2032_s17 = smov (!%p241_p9), 80  }
  0x10   : > { %s2033_s22 = smov (!%p241_p9), 64   ;;  %s2034_s8 = smov (!%p241_p9), 16  }
  0x13   : > { %vm428_vm0 = vcmask 1042432   ;;  %vm429_vm1 = vcmask 1046532   ;;  %v1922_v0 = vld [vmem:[%s2675_s1 + $0x38] sm:$0xff]   ;;  %s272_s15 = scalar_select %p271_p10, %s2100_s28, 1  ;;  %v2028_v1 = vmov 0   ;;  %v1923_v3 = vld [vmem:[%s2675_s1 + $0x30] sm:$0xff]  }
  0x14   : > { %778 = vmatprep.subr.bf16.mxu0 %v2028_v1  ;;  %vm2134_vm2 = vmor %vm428_vm0, %vm429_vm1  ;;  %v1924_v4 = vld [vmem:[%s2675_s1 + $0x28] sm:$0xff]   ;;  %vm297_vm3 = vsmask.f32 3328  ;;  %vm298_vm4 = vsmask.f32 7440  ;;  %v1925_v27 = vld [vmem:[%s2675_s1 + $0x20] sm:$0xff]  }
  0x15   : > { %779 = vmatpush1.bf16.msra.mxu0 %v1922_v0  ;;  %s1814_s16 = smul.u32 80, %s272_s15  ;;  %v1926_v44 = vld [vmem:[%s2675_s1 + $0x18] sm:$0xff]   ;;  %vm2210_vm5 = vmor %vm297_vm3, %vm298_vm4  ;;  %v1927_v0 = vld [vmem:[%s2675_s1 + $0x10] sm:$0xff]   ;;  %vm616_vm6 = vcmask 130048   ;;  %vm629_vm7 = vcmask 261120   ;;  %vm638_vm8 = vcmask 392192  }
  0x16   : > { %780 = vmatprep.subr.bf16.mxu0 %v2028_v1  ;;  %vm647_vm9 = vcmask 523264   ;;  %vm656_vm10 = vcmask 654336   ;;  %vm665_vm11 = vcmask 785408   ;;  %vm674_vm12 = vcmask 916480  }
  0x17   : > { %s2148_s23 = scalar_lea.vmem %s2674_s0, %s1814_s16  ;;  %s2035_s16 = smov 112   ;;  %vm960_vm13 = vcmask 1040384   ;;  %vm968_vm14 = vcmask 1046528   ;;  %vm1130_vm15 = vcmask 1041408   ;;  %vm1138_vm1 = vcmask 1043456  }
  0x18   : > { %v2151_v5 = vld [vmem:[%s2148_s23 + $0x8] sm:$0xf]  ;;  %v281_v6 = vld [vmem:[%s2148_s23 + $0x10] sm:$0xf]  ;;  %v2155_v7 = vld [vmem:[%s2148_s23] sm:$0xf] }
  0x19   : > { %781 = vmatpush1.bf16.msra.mxu0 %v1923_v3  ;;  %v1691_v8 = vcombine.low %v2151_v5, %v281_v6  ;;  %v278_v9 = vld [vmem:[%s2148_s23 + $0x4] sm:$0x1]  ;;  %v280_v10 = vld [vmem:[%s2148_s23 + $0xc] sm:$0x1]  ;;  %v282_v11 = vld [vmem:[%s2148_s23 + $0x14] sm:$0x1] }
  0x1a   : > { %782 = vmatprep.subr.bf16.mxu0 %v2028_v1  ;;  %v310_v12 = vshll.u32 %v278_v9, 16  ;;  %v324_v13 = vshll.u32 %v280_v10, 16  ;;  %v1669_v14 = vrot.slane %v2155_v7, 9  ;;  %v433_v15 = vrot.slane %v278_v9, 5  ;;  %v2164_v16 = vld [vmem:[%s2148_s23 + $0x18] sm:$0xf] }
  0x1b   : > { %560 = vrot.lane.b32.xlu1 %v1691_v8, %s2029_s29  ;;  %v1670_v17 = vrot.slane %v2151_v5, 9  ;;  %v437_v18 = vrot.slane %v280_v10, 5  ;;  %v1671_v19 = vrot.slane %v281_v6, 9  ;;  %v441_v20 = vrot.slane %v282_v11, 5  ;;  %v2169_v21 = vld [vmem:[%s2148_s23 + $0x20] sm:$0xf] }
  0x1c   : > { %v434_v22 = vsel %vm2134_vm2, %v1669_v14, %v433_v15  ;;  %v2174_v23 = vcombine.low %v281_v6, %v2164_v16  ;;  %v1692_v24 = vcombine.low %v2164_v16, %v2169_v21  ;;  %v284_v25 = vld [vmem:[%s2148_s23 + $0x1c] sm:$0x1]  ;;  %v1672_v26 = vrot.slane %v2164_v16, 9  ;;  %v286_v58 = vld [vmem:[%s2148_s23 + $0x24] sm:$0x1]  ;;  %v1928_v14 = vld [vmem:[%s2675_s1 + $0x8] sm:$0xff]  }
  0x1d   : > { %783 = vmatpush1.bf16.msra.mxu0 %v1924_v4  ;;  %v438_v28 = vsel %vm2134_vm2, %v1670_v17, %v437_v18  ;;  %v442_v29 = vsel %vm2134_vm2, %v1671_v19, %v441_v20  ;;  %v445_v30 = vrot.slane %v284_v25, 5  ;;  %v315_v31 = vshrl.u32 %v2151_v5, 16  ;;  %v2220_v63 = vld [vmem:[%s2148_s23 + $0x28] sm:$0xf] }
  0x1e   : > { %784 = vmatprep.subr.bf16.mxu0 %v2028_v1  ;;  %v1687_v32 = vcombine.low %v434_v22, %v438_v28  ;;  %v1699_v33 = vcombine.low %v438_v28, %v442_v29  ;;  %v318_v34 = vshll.u32 %v2151_v5, 16  ;;  %v326_v35 = vrot.slane %v324_v13, 5  ;;  %v288_v13 = vld [vmem:[%s2148_s23 + $0x2c] sm:$0x1]  ;;  %v2241_v28 = vld [vmem:[%s2148_s23 + $0x30] sm:$0xf] }
  0x1f   : > { %596 = vrot.lane.b32.xlu1 %v2174_v23, %s2030_s13  ;;  %v2194_v36 = vsel %vm2134_vm2, %v1672_v26, %v445_v30  ;;  %v317_v37 = vrot.slane %v315_v31, 4  ;;  %v329_v38 = vshrl.u32 %v281_v6, 16  ;;  %v332_v39 = vshll.u32 %v281_v6, 16 }
  0x20   : > { %547 = vrot.lane.b32.xlu0 %v1687_v32, %s2031_s14  ;;  %v2198_v40 = vcombine.low %v442_v29, %v2194_v36  ;;  %v320_v41 = vrot.slane %v318_v34, 5  ;;  %v338_v42 = vshll.u32 %v282_v11, 16  ;;  %v301_v43 = vshrl.u32 %v2155_v7, 16 }
  0x21   : > { %785 = vmatpush1.bf16.msra.mxu0 %v1925_v27  ;;  %v331_v45 = vrot.slane %v329_v38, 4  ;;  %v334_v46 = vrot.slane %v332_v39, 5  ;;  %v304_v47 = vshll.u32 %v2155_v7, 16  ;;  %v312_v48 = vrot.slane %v310_v12, 5 }
  0x22   : > { %786 = vmatprep.subr.bf16.mxu0 %v2028_v1  ;;  %v321_v49 = vor.u32 %v320_v41, %v317_v37  ;;  %v340_v50 = vrot.slane %v338_v42, 5  ;;  %v303_v51 = vrot.slane %v301_v43, 4  ;;  %v343_v52 = vshrl.u32 %v2164_v16, 16  ;;  %v2255_v41 = vld [vmem:[%s2148_s23 + $0x38] sm:$0xf]  ;;  %v1930_v42 = vld [vmem:[%s2675_s1] sm:$0xff]   ;;  %1716 = vmatprep.mubr.msk.bf16.mxu0 %vm616_vm6, %v2198_v40 }
  0x23   : > { %562 = vrot.lane.b32.xlu1 %v1692_v24, %s2029_s29  ;;  %v335_v54 = vor.u32 %v334_v46, %v331_v45  ;;  %v306_v55 = vrot.slane %v304_v47, 5  ;;  %v346_v56 = vshll.u32 %v2164_v16, 16  ;;  %v352_v57 = vshll.u32 %v284_v25, 16 }
  0x24   : > { %586 = vrot.lane.b32.xlu0 %v1699_v33, %s2032_s17  ;;  %v322_v59 = vrot.slane %v321_v49, 4  ;;  %v345_v60 = vrot.slane %v343_v52, 4  ;;  %v357_v61 = vshrl.u32 %v2169_v21, 16  ;;  %v360_v62 = vshll.u32 %v2169_v21, 16  ;;  %v2249_v33 = vld [vmem:[%s2148_s23 + $0x34] sm:$0x1] }
  0x25   : > { %787 = vmatpush1.bf16.msra.mxu0 %v1926_v44  ;;  %v336_v3 = vrot.slane %v335_v54, 4  ;;  %v307_v4 = vor.u32 %v306_v55, %v303_v51  ;;  %v348_v6 = vrot.slane %v346_v56, 5  ;;  %v354_v8 = vrot.slane %v352_v57, 5  ;;  %v1931_v56 = vld [vmem:[%s2675_s1 + $0x40] sm:$0xff]   ;;  %v2274_v57 = vld [vmem:[%s2148_s23 + $0x3c] sm:$0x1] }
  0x26   : > { %788 = vmatprep.subr.bf16.mxu0 %v2028_v1  ;;  %v327_v9 = vsel %vm2210_vm5, %v322_v59, %v326_v35  ;;  %v359_v10 = vrot.slane %v357_v61, 4  ;;  %v362_v11 = vrot.slane %v360_v62, 5  ;;  %v366_v12 = vshll.u32 %v286_v58, 16 }
  0x27   : > { %v341_v15 = vsel %vm2210_vm5, %v336_v3, %v340_v50  ;;  %v308_v16 = vrot.slane %v307_v4, 4  ;;  %v349_v17 = vor.u32 %v348_v6, %v345_v60  ;;  %v1673_v18 = vrot.slane %v2169_v21, 9 }
  0x28   : > { %549 = vrot.lane.b32.xlu0 %v2198_v40, %s2031_s14  ;;  %v1695_v19 = vcombine.low %v327_v9, %v341_v15  ;;  %v363_v20 = vor.u32 %v362_v11, %v359_v10  ;;  %v368_v22 = vrot.slane %v366_v12, 5  ;;  %v449_v24 = vrot.slane %v286_v58, 5  ;;  %v294_v11 = vld [vmem:[%s2148_s23 + $0x44] sm:$0x1] }
  0x29   : > { %789 = vmatpush1.bf16.msra.mxu0 %v1927_v0  ;;  %v313_v25 = vsel %vm2210_vm5, %v308_v16, %v312_v48  ;;  %v350_v26 = vrot.slane %v349_v17, 4  ;;  %v371_v27 = vshrl.u32 %v2220_v63, 16  ;;  %v374_v32 = vshll.u32 %v2220_v63, 16  ;;  %v2287_v0 = vld [vmem:[%s2148_s23 + $0x40] sm:$0xf] }
  0x2a   : > { %790 = vmatprep.subr.bf16.mxu0 %v2028_v1  ;;  %573 = vrot.lane.b32.xlu1 %v1695_v19, %s2033_s22  ;;  %v1683_v29 = vcombine.low %v313_v25, %v327_v9  ;;  %v364_v30 = vrot.slane %v363_v20, 4  ;;  %v450_v31 = vsel %vm2134_vm2, %v1673_v18, %v449_v24  ;;  %v380_v37 = vshll.u32 %v288_v13, 16  ;;  %v2300_v16 = vld [vmem:[%s2148_s23 + $0x48] sm:$0xf] }
  0x2b   : > { %v355_v34 = vsel %vm2210_vm5, %v350_v26, %v354_v8  ;;  %v373_v35 = vrot.slane %v371_v27, 4  ;;  %v376_v39 = vrot.slane %v374_v32, 5  ;;  %v1700_v44 = vcombine.low %v2194_v36, %v450_v31 }
  0x2c   : > { %527 = vrot.lane.b32.xlu0 %v1683_v29, %s2034_s8  ;;  %v1684_v38 = vcombine.low %v341_v15, %v355_v34  ;;  %v369_v43 = vsel %vm2210_vm5, %v364_v30, %v368_v22  ;;  %v382_v45 = vrot.slane %v380_v37, 5  ;;  %v1674_v46 = vrot.slane %v2220_v63, 9 }
  0x2d   : > { %791 = vmatpush1.bf16.msra.mxu0 %v1928_v14  ;;  %v377_v47 = vor.u32 %v376_v39, %v373_v35  ;;  %v453_v48 = vrot.slane %v288_v13, 5  ;;  %v385_v49 = vshrl.u32 %v2241_v28, 16  ;;  %v388_v50 = vshll.u32 %v2241_v28, 16 }
  0x2e   : > { %792 = vmatprep.subr.bf16.mxu0 %v2028_v1  ;;  %529 = vrot.lane.b32.xlu1 %v1684_v38, %s2034_s8  ;;  %v394_v51 = vshll.u32 %v2249_v33, 16  ;;  %v1696_v36 = vcombine.low %v355_v34, %v369_v43  ;;  %v399_v58 = vshrl.u32 %v2255_v41, 16  ;;  %v402_v59 = vshll.u32 %v2255_v41, 16 }
  0x2f   : > { %v378_v52 = vrot.slane %v377_v47, 4  ;;  %v387_v54 = vrot.slane %v385_v49, 4  ;;  %v390_v55 = vrot.slane %v388_v50, 5  ;;  %v2284_v61 = vsel %vm2134_vm2, %v1674_v46, %v453_v48 }
  0x30   : > { %606 = vrot.lane.b32.xlu0 %v1684_v38, %s2035_s16  ;;  %v396_v4 = vrot.slane %v394_v51, 5  ;;  %v401_v6 = vrot.slane %v399_v58, 4  ;;  %v404_v8 = vrot.slane %v402_v59, 5  ;;  %v408_v10 = vshll.u32 %v2274_v57, 16 }
  0x31   : > { %793 = vmatpush1.bf16.msra.mxu0 %v1930_v42  ;;  %v383_v60 = vsel %vm2210_vm5, %v378_v52, %v382_v45  ;;  %v391_v62 = vor.u32 %v390_v55, %v387_v54  ;;  %v1675_v12 = vrot.slane %v2241_v28, 9  ;;  %v464_v14 = vshrl.u32 %v2287_v0, 16 }
  0x32   : > { %808 = vmatprep.subr.bf16.mxu0 %v2028_v1  ;;  %588 = vrot.lane.b32.xlu1 %v1700_v44, %s2032_s17  ;;  %v1685_v3 = vcombine.low %v369_v43, %v383_v60  ;;  %v2292_v1 = vcombine.low %v2169_v21, %v2220_v63  ;;  %v405_v13 = vor.u32 %v404_v8, %v401_v6  ;;  %v467_v15 = vshll.u32 %v2287_v0, 16  ;;  %v296_v21 = vld [vmem:[%s2148_s23 + $0x4c] sm:$0x1]  ;;  %s269_s23 = sand.u32 1, %s2018_s25  }
  0x33   : > { %v392_v9 = vrot.slane %v391_v62, 4  ;;  %v2304_v17 = vcombine.low %v450_v31, %v2284_v61  ;;  %v1677_v18 = vrot.slane %v2287_v0, 9  ;;  %v481_v19 = vrot.slane %v294_v11, 5  ;;  %s1597_s9 = scalar_lea.sflag [#allocation3], %s269_s23 }
  0x34   : > { %575 = vrot.lane.b32.xlu0 %v1696_v36, %s2033_s22  ;;  %v457_v22 = vrot.slane %v2249_v33, 5  ;;  %v466_v24 = vrot.slane %v464_v14, 4  ;;  %v410_v25 = vrot.slane %v408_v10, 5  ;;  %v469_v26 = vrot.slane %v467_v15, 5 }
  0x35   : > { %809 = vmatpush2.bf16.msra.mxu0 %v1931_v56  ;;  %v397_v20 = vsel %vm2210_vm5, %v392_v9, %v396_v4  ;;  %v473_v27 = vshll.u32 %v294_v11, 16  ;;  %v1678_v29 = vrot.slane %v2300_v16, 9  ;;  %v1693_v30 = vcombine.low %v2220_v63, %v2241_v28 }
  0x36   : > { %608 = vrot.lane.b32.xlu1 %v1685_v3, %s2035_s16  ;;  %v406_v31 = vrot.slane %v405_v13, 4  ;;  %v501_v32 = vrot.slane %v296_v21, 5  ;;  %v1697_v34 = vcombine.low %v383_v60, %v397_v20  ;;  %v2320_v33 = vsel %vm2134_vm2, %v1677_v18, %v481_v19 }
  0x37   : > { %v484_v35 = vshrl.u32 %v2300_v16, 16  ;;  %v487_v37 = vshll.u32 %v2300_v16, 16  ;;  %v470_v38 = vor.u32 %v469_v26, %v466_v24  ;;  %v1679_v63 = vcombine.low %v2155_v7, %v2151_v5 }
  0x38   : > { %598 = vrot.lane.b32.xlu0 %v2292_v1, %s2030_s13  ;;  %v2326_v39 = vsel %vm2134_vm2, %v1678_v29, %v501_v32  ;;  %v493_v45 = vshll.u32 %v296_v21, 16  ;;  %v458_v46 = vsel %vm2134_vm2, %v1675_v12, %v457_v22  ;;  %v2340_v5 = vcombine.low %v2241_v28, %v2255_v41 }
  0x39   : > { %v1705_v42 = vcombine.low %v2320_v33, %v2326_v39  ;;  %v486_v43 = vrot.slane %v484_v35, 4  ;;  %v489_v44 = vrot.slane %v487_v37, 5  ;;  %v1676_v7 = vrot.slane %v2255_v41, 9 }
  0x3a   : > { %551 = vrot.lane.b32.xlu1 %v2304_v17, %s2031_s14  ;;  %v461_v47 = vrot.slane %v2274_v57, 5  ;;  %v411_v49 = vsel %vm2210_vm5, %v406_v31, %v410_v25  ;;  %v471_v50 = vrot.slane %v470_v38, 4  ;;  %v475_v51 = vrot.slane %v473_v27, 5 }
  0x3b   : > { %v490_v48 = vor.u32 %v489_v44, %v486_v43  ;;  %v1701_v40 = vcombine.low %v2284_v61, %v458_v46  ;;  %v495_v52 = vrot.slane %v493_v45, 5  ;;  %v1686_v28 = vcombine.low %v397_v20, %v411_v49 }
  0x3c   : > { %531 = vrot.lane.b32.xlu0 %v1685_v3, %s2034_s8  ;;  %v462_v54 = vsel %vm2134_vm2, %v1676_v7, %v461_v47  ;;  %v1694_v55 = vcombine.low %v2255_v41, %v2287_v0  ;;  %v476_v57 = vsel %vm2210_vm5, %v471_v50, %v475_v51  ;;  %v1703_v41 = vcombine.low %v2287_v0, %v2300_v16 }
  0x3d   : > { %v491_v36 = vrot.slane %v490_v48, 4  ;;  %v1690_v56 = vcombine.low %v458_v46, %v462_v54  ;;  %v1702_v58 = vcombine.low %v462_v54, %v2320_v33  ;;  %v1698_v2 = vcombine.low %v411_v49, %v476_v57 }
  0x3e   : > { %577 = vrot.lane.b32.xlu1 %v1697_v34, %s2033_s22  ;;  %vm1142_vm2 = vcmask 1044480   ;;  %vm1146_vm3 = vcmask 1045504  }
  0x3f   : > { %v496_v59 = vsel %vm2210_vm5, %v491_v36, %v495_v52 }
  0x40   : > { %564 = vrot.lane.b32.xlu0 %v1693_v30, %s2029_s29  ;;  %v1704_v60 = vcombine.low %v476_v57, %v496_v59 }
  0x42   : > { %600 = vrot.lane.b32.xlu1 %v2340_v5, %s2030_s13 }
  0x44   : > { %590 = vrot.lane.b32.xlu0 %v1701_v40, %s2032_s17 }
  0x46   : > { %533 = vrot.lane.b32.xlu1 %v1686_v28, %s2034_s8 }
  0x48   : > { %610 = vrot.lane.b32.xlu0 %v1686_v28, %s2035_s16 }
  0x4a   : > { %566 = vrot.lane.b32.xlu1 %v1694_v55, %s2029_s29  ;;  %s270_s29 = scalar_lea.vmem [#allocation2], %s269_s23 }
  0x4c   : > { %553 = vrot.lane.b32.xlu0 %v1690_v56, %s2031_s14 }
  0x4e   : > { %592 = vrot.lane.b32.xlu1 %v1702_v58, %s2032_s17  ;;  %s1609_s17 = sshll.u32 %s270_s29, 4  ;;  %s1610_s17 = int_to_ptr.vmem [resolvable:$true] %s1609_s17 }
  0x4f   : > { %s1966_s15 = scalar_lea.vmem %s1610_s17, 16 }
  0x50   : > { %579 = vrot.lane.b32.xlu0 %v1698_v2, %s2033_s22  ;;  %p1967_p11 = scmp.ne.s32.totalorder %s1610_s17, %s1966_s15 }
  0x52   : > { %612 = vrot.lane.b32.xlu1 %v1704_v60, %s2035_s16  ;;  %p1968_p12 = pnand %p1967_p11, %p2117_p5 }
  0x54   : > { %602 = vrot.lane.b32.xlu0 %v1703_v41, %s2030_s13  ;;  %p1969_p13 = pneg %p1968_p12 }
  0x8d   : > { %v561_v61 = vpop.permute.xlu1 %560 }
  0x91   : > { %v597_v62 = vpop.permute.xlu1 %596 }
  0x92   : > { %v548_v3 = vpop.permute.xlu0 %547 }
  0x95   : > { %v563_v4 = vpop.permute.xlu1 %562 }
  0x96   : > { %v587_v53 = vpop.permute.xlu0 %586 }
  0x9a   : > { %v550_v6 = vpop.permute.xlu0 %549 }
  0x9c   : > { %v574_v8 = vpop.permute.xlu1 %573 }
  0x9e   : > { %v528_v9 = vpop.permute.xlu0 %527 }
  0x9f   : > { %v619_v10 = vsel %vm616_vm6, %v1679_v63, %v528_v9 }
  0xa0   : > { %v631_v11 = vsel %vm629_vm7, %v619_v10, %v548_v3  ;;  %v530_v0 = vpop.permute.xlu1 %529 }
  0xa1   : > { %v640_v12 = vsel %vm638_vm8, %v631_v11, %v561_v61  ;;  %v622_v13 = vsel %vm616_vm6, %v2174_v23, %v530_v0 }
  0xa2   : > { %v607_v14 = vpop.permute.xlu0 %606  ;;  %v649_v15 = vsel %vm647_vm9, %v640_v12, %v574_v8  ;;  %v633_v16 = vsel %vm629_vm7, %v622_v13, %v550_v6 }
  0xa3   : > { %v658_v21 = vsel %vm656_vm10, %v649_v15, %v587_v53  ;;  %v642_v22 = vsel %vm638_vm8, %v633_v16, %v563_v4 }
  0xa4   : > { %v667_v18 = vsel %vm665_vm11, %v658_v21, %v597_v62  ;;  %v589_v19 = vpop.permute.xlu1 %588 }
  0xa5   : > { %v676_v20 = vsel %vm674_vm12, %v667_v18, %v607_v14 }
  0xa6   : > { %811 = vmatmul.mubr.bf16.vlgmr.msra.gmra.mxu0 %v676_v20  ;;  %v576_v24 = vpop.permute.xlu0 %575 }
  0xa7   : > { %v651_v23 = vsel %vm647_vm9, %v642_v22, %v576_v24  ;;  %1717 = vmatprep.mubr.msk.bf16.mxu0 %vm616_vm6, %v2304_v17 }
  0xa8   : > { %v609_v25 = vpop.permute.xlu1 %608  ;;  %v660_v26 = vsel %vm656_vm10, %v651_v23, %v589_v19 }
  0xaa   : > { %v599_v27 = vpop.permute.xlu0 %598 }
  0xab   : > { %v669_v29 = vsel %vm665_vm11, %v660_v26, %v599_v27  ;;  %v2036_v26 = vmov 0.0  }
  0xac   : > { %v679_v30 = vsel %vm674_vm12, %v669_v29, %v609_v25  ;;  %v552_v31 = vpop.permute.xlu1 %551  ;;  %v946_v27 = vrot.slane %v2036_v26, 7 }
  0xae   : > { %819 = vmatmul.mubr.bf16.gmra.mxu0 %v679_v30  ;;  %v532_v32 = vpop.permute.xlu0 %531 }
  0xaf   : > { %v625_v34 = vsel %vm616_vm6, %v2292_v1, %v532_v32  ;;  %1718 = vmatprep.mubr.msk.bf16.mxu0 %vm616_vm6, %v1690_v56 }
  0xb0   : > { %v578_v35 = vpop.permute.xlu1 %577  ;;  %v635_v37 = vsel %vm629_vm7, %v625_v34, %v552_v31 }
  0xb2   : > { %v565_v17 = vpop.permute.xlu0 %564 }
  0xb3   : > { %v644_v38 = vsel %vm638_vm8, %v635_v37, %v565_v17 }
  0xb4   : > { %v601_v63 = vpop.permute.xlu1 %600  ;;  %v653_v43 = vsel %vm647_vm9, %v644_v38, %v578_v35  ;;  %v961_v38 = vsel %vm960_vm13, 0.0, %v946_v27 }
  0xb6   : > { %v591_v44 = vpop.permute.xlu0 %590 }
  0xb7   : > { %v662_v45 = vsel %vm656_vm10, %v653_v43, %v591_v44 }
  0xb8   : > { %v534_v46 = vpop.permute.xlu1 %533  ;;  %v671_v7 = vsel %vm665_vm11, %v662_v45, %v601_v63 }
  0xb9   : > { %v628_v49 = vsel %vm616_vm6, %v2340_v5, %v534_v46 }
  0xba   : > { %v611_v47 = vpop.permute.xlu0 %610 }
  0xbb   : > { %v682_v1 = vsel %vm674_vm12, %v671_v7, %v611_v47 }
  0xbc   : > { %827 = vmatmul.mubr.bf16.gmra.mxu0 %v682_v1  ;;  %v567_v48 = vpop.permute.xlu1 %566  ;;  %v2421_v1 = vsel %vm968_vm14, %v961_v38, 0.0 }
  0xbd   : > { %1719 = vmatprep.mubr.msk.bf16.mxu0 %vm616_vm6, %v1705_v42  ;;  %v2411_v42 = vld [vmem:[%s2676_s2] ss:$0 sm:$0xff] }
  0xbe   : > { %v554_v50 = vpop.permute.xlu0 %553 }
  0xbf   : > { %v637_v51 = vsel %vm629_vm7, %v628_v49, %v554_v50 }
  0xc0   : > { %v593_v40 = vpop.permute.xlu1 %592  ;;  %v646_v36 = vsel %vm638_vm8, %v637_v51, %v567_v48 }
  0xc2   : > { %v580_v52 = vpop.permute.xlu0 %579 }
  0xc3   : > { %v655_v28 = vsel %vm647_vm9, %v646_v36, %v580_v52 }
  0xc4   : > { %v613_v54 = vpop.permute.xlu1 %612  ;;  %v664_v55 = vsel %vm656_vm10, %v655_v28, %v593_v40 }
  0xc6   : > { %v603_v56 = vpop.permute.xlu0 %602 }
  0xc7   : > { %v673_v33 = vsel %vm665_vm11, %v664_v55, %v603_v56  ;;  %v977_v55 = vrot.slane %v2421_v1, 1  ;;  %v1932_v56 = vld [vmem:[%s2677_s3 + $0x78] sm:$0xff]  }
  0xc8   : > { %v685_v39 = vsel %vm674_vm12, %v673_v33, %v613_v54  ;;  %1759 = vmatprep.subr.bf16.mxu1 %v1932_v56 }
  0xc9   : > { %835 = vmatmul.mubr.bf16.gmra.mxu0 %v685_v39 }
 0x166   : > { %v812_v5 = vpop.f32.mrf.mxu0 }
 0x167   : > { %v813_v57 = vadd.f32 %v2411_v42, %v812_v5 }
 0x168   : > { %v814_v58 = vpop.f32.mrf.mxu0 }
 0x169   : > { %v843_v59 = vmax.f32 %v813_v57, 0.0  ;;  %v1933_v57 = vld [vmem:[%s2677_s3 + $0x38] sm:$0xff]  }
 0x16a   : > { %v815_v2 = vpop.f32.mrf.mxu0  ;;  %1760 = vmatpush3.bf16.msra.mxu1 %v1933_v57 }
 0x16b   : > { %v857_v60 = vrot.slane %v843_v59, 1  ;;  %v816_v41 = vadd.f32 %v2411_v42, %v815_v2  ;;  %v875_v3 = vrot.slane %v843_v59, 2 }
 0x16c   : > { %v817_v61 = vpop.f32.mrf.mxu0 }
 0x16d   : > { %v869_v62 = vmax.f32 %v843_v59, %v857_v60  ;;  %v844_v53 = vmax.f32 %v816_v41, 0.0  ;;  %v981_v41 = vrot.slane %v2421_v1, 2 }
 0x16e   : > { %v820_v4 = vpop.f32.mrf.mxu0 }
 0x16f   : > { %v887_v6 = vmax.f32 %v869_v62, %v875_v3  ;;  %v858_v8 = vrot.slane %v844_v53, 1  ;;  %v821_v9 = vadd.f32 %v2411_v42, %v820_v4  ;;  %v876_v0 = vrot.slane %v844_v53, 2 }
 0x170   : > { %v822_v10 = vpop.f32.mrf.mxu0 }
 0x171   : > { %v870_v11 = vmax.f32 %v844_v53, %v858_v8  ;;  %v893_v12 = vmax.f32 %v887_v6, %v844_v53  ;;  %v845_v13 = vmax.f32 %v821_v9, 0.0  ;;  %v1934_v9 = vld [vmem:[%s2677_s3 + $0x70] sm:$0xff]  }
 0x172   : > { %v823_v14 = vpop.f32.mrf.mxu0  ;;  %v1935_v10 = vld [vmem:[%s2677_s3 + $0x30] sm:$0xff]   ;;  %1761 = vmatprep.subr.bf16.mxu1 %v1934_v9 }
 0x173   : > { %v888_v15 = vmax.f32 %v870_v11, %v876_v0  ;;  %v902_v16 = vmax.f32 %v893_v12, %v858_v8  ;;  %v859_v21 = vrot.slane %v845_v13, 1  ;;  %v824_v18 = vadd.f32 %v2411_v42, %v823_v14  ;;  %1762 = vmatpush3.bf16.msra.mxu1 %v1935_v10 }
 0x174   : > { %v825_v19 = vpop.f32.mrf.mxu0  ;;  %v877_v24 = vrot.slane %v845_v13, 2 }
 0x175   : > { %v910_v20 = vmax.f32 %v902_v16, %v876_v0  ;;  %v871_v22 = vmax.f32 %v845_v13, %v859_v21  ;;  %v894_v23 = vmax.f32 %v888_v15, %v845_v13  ;;  %v846_v25 = vmax.f32 %v824_v18, 0.0 }
 0x177   : > { %v903_v29 = vmax.f32 %v894_v23, %v859_v21  ;;  %v916_v30 = vmax.f32 %v910_v20, %v845_v13  ;;  %v889_v31 = vmax.f32 %v871_v22, %v877_v24  ;;  %v860_v32 = vrot.slane %v846_v25, 1  ;;  %v1936_v23 = vld [vmem:[%s2677_s3 + $0x68] sm:$0xff]  }
 0x178   : > { %v878_v45 = vrot.slane %v846_v25, 2  ;;  %1763 = vmatprep.subr.bf16.mxu1 %v1936_v23  ;;  %v1944_v23 = vld [vmem:[%s2677_s3 + $0x48] sm:$0xff]  }
 0x179   : > { %v895_v34 = vmax.f32 %v889_v31, %v846_v25  ;;  %v911_v35 = vmax.f32 %v903_v29, %v877_v24  ;;  %v925_v37 = vmax.f32 %v916_v30, %v859_v21  ;;  %v872_v17 = vmax.f32 %v846_v25, %v860_v32 }
 0x17b   : > { %v904_v63 = vmax.f32 %v895_v34, %v860_v32  ;;  %v917_v43 = vmax.f32 %v911_v35, %v846_v25  ;;  %v933_v44 = vmax.f32 %v925_v37, %v877_v24  ;;  %v890_v49 = vmax.f32 %v872_v17, %v878_v45  ;;  %v1937_v25 = vld [vmem:[%s2677_s3 + $0x28] sm:$0xff]  }
 0x17c   : > { %v828_v46 = vpop.f32.mrf.mxu0  ;;  %1764 = vmatpush3.bf16.msra.mxu1 %v1937_v25  ;;  %v1945_v25 = vld [vmem:[%s2677_s3 + $0x8] sm:$0xff]  }
 0x17d   : > { %v829_v7 = vadd.f32 %v2411_v42, %v828_v46  ;;  %v947_v47 = vrot.slane %v933_v44, 7  ;;  %v926_v48 = vmax.f32 %v917_v43, %v860_v32  ;;  %v912_v40 = vmax.f32 %v904_v63, %v878_v45  ;;  %v1938_v46 = vld [vmem:[%s2677_s3 + $0x60] sm:$0xff]  }
 0x17e   : > { %v830_v50 = vpop.f32.mrf.mxu0  ;;  %1765 = vmatprep.subr.bf16.mxu1 %v1938_v46 }
 0x17f   : > { %v847_v51 = vmax.f32 %v829_v7, 0.0  ;;  %v962_v36 = vsel %vm960_vm13, 0.0, %v947_v47  ;;  %v934_v52 = vmax.f32 %v926_v48, %v878_v45  ;;  %v1940_v50 = vld [vmem:[%s2677_s3 + $0x58] sm:$0xff]  }
 0x180   : > { %v831_v28 = vpop.f32.mrf.mxu0  ;;  %v2425_v54 = vsel %vm968_vm14, %v962_v36, 0.0 }
 0x181   : > { %v861_v33 = vrot.slane %v847_v51, 1  ;;  %v896_v39 = vmax.f32 %v890_v49, %v847_v51  ;;  %v918_v5 = vmax.f32 %v912_v40, %v847_v51  ;;  %v832_v58 = vadd.f32 %v2411_v42, %v831_v28  ;;  %v1939_v49 = vld [vmem:[%s2677_s3 + $0x20] sm:$0xff]  }
 0x182   : > { %v833_v59 = vpop.f32.mrf.mxu0  ;;  %v991_v2 = vrot.slane %v2425_v54, 2  ;;  %v948_v60 = vrot.slane %v934_v52, 7  ;;  %v879_v62 = vrot.slane %v847_v51, 2  ;;  %1766 = vmatpush3.bf16.msra.mxu1 %v1939_v49 }
 0x183   : > { %v873_v61 = vmax.f32 %v847_v51, %v861_v33  ;;  %v905_v3 = vmax.f32 %v896_v39, %v861_v33  ;;  %v927_v53 = vmax.f32 %v918_v5, %v861_v33  ;;  %v848_v4 = vmax.f32 %v832_v58, 0.0  ;;  %1767 = vmatprep.subr.bf16.mxu1 %v1940_v50 }
 0x184   : > { %v1864_v6 = vpack.i.bf16 %v977_v55, %v991_v2  ;;  %v963_v8 = vsel %vm960_vm13, 0.0, %v948_v60  ;;  %v989_v50 = vrot.slane %v2425_v54, 1 }
 0x185   : > { %v891_v11 = vmax.f32 %v873_v61, %v879_v62  ;;  %v913_v0 = vmax.f32 %v905_v3, %v879_v62  ;;  %v2445_v12 = vsel %vm968_vm14, %v963_v8, 0.0  ;;  %v935_v13 = vmax.f32 %v927_v53, %v879_v62  ;;  %v1942_v61 = vld [vmem:[%s2677_s3 + $0x50] sm:$0xff]  }
 0x186   : > { %v862_v14 = vrot.slane %v848_v4, 1  ;;  %1865 = vrot.lane.b32.xlu0 %v1864_v6, %s2031_s14  ;;  %v1869_v15 = vpack.i.bf16 %v981_v41, %v2445_v12  ;;  %v999_v16 = vrot.slane %v2445_v12, 1  ;;  %v1003_v20 = vrot.slane %v2445_v12, 2  ;;  %v1941_v41 = vld [vmem:[%s2677_s3 + $0x18] sm:$0xff]  }
 0x187   : > { %v897_v21 = vmax.f32 %v891_v11, %v848_v4  ;;  %v919_v18 = vmax.f32 %v913_v0, %v848_v4  ;;  %v949_v19 = vrot.slane %v935_v13, 7  ;;  %v880_v27 = vrot.slane %v848_v4, 2  ;;  %1768 = vmatpush3.bf16.msra.mxu1 %v1941_v41  ;;  %v1943_v0 = vld [vmem:[%s2677_s3 + $0x10] sm:$0xff]  }
 0x188   : > { %1870 = vrot.lane.b32.xlu1 %v1869_v15, %s2033_s22  ;;  %v1874_v22 = vpack.i.bf16 %v2425_v54, %v999_v16  ;;  %v874_v24 = vmax.f32 %v848_v4, %v862_v14  ;;  %v1077_v43 = vrot.slane %v1003_v20, 1  ;;  %v1083_v56 = vrot.slane %v1003_v20, 2  ;;  %1769 = vmatprep.subr.bf16.mxu1 %v1942_v61 }
 0x189   : > { %v836_v29 = vpop.f32.mrf.mxu0  ;;  %v906_v30 = vmax.f32 %v897_v21, %v862_v14  ;;  %v964_v31 = vsel %vm960_vm13, 0.0, %v949_v19  ;;  %v928_v32 = vmax.f32 %v919_v18, %v862_v14 }
 0x18a   : > { %1875 = vrot.lane.b32.xlu0 %v1874_v22, %s2030_s13  ;;  %v837_v34 = vadd.f32 %v2411_v42, %v836_v29  ;;  %v2463_v35 = vsel %vm968_vm14, %v964_v31, 0.0  ;;  %v892_v45 = vmax.f32 %v874_v24, %v880_v27  ;;  %v1129_v33 = vsel %vm960_vm13, %v1003_v20, %v1077_v43  ;;  %v1947_v31 = vld [vmem:[%s2677_s3] sm:$0xff]  }
 0x18b   : > { %v914_v37 = vmax.f32 %v906_v30, %v880_v27  ;;  %v838_v17 = vpop.f32.mrf.mxu0  ;;  %v1023_v38 = vrot.slane %v2463_v35, 2  ;;  %v936_v63 = vmax.f32 %v928_v32, %v880_v27  ;;  %v1133_v4 = vsel %vm1130_vm15, %v1129_v33, %v1083_v56  ;;  %1770 = vmatpush3.bf16.msra.mxu1 %v1943_v0  ;;  %v1946_v27 = vld [vmem:[%s2677_s3 + $0x40] sm:$0xff]  }
 0x18c   : > { %v849_v44 = vmax.f32 %v837_v34, 0.0  ;;  %1771 = vmatprep.subr.bf16.mxu1 %v1944_v23 }
 0x18d   : > { %v839_v7 = vpop.f32.mrf.mxu0  ;;  %v1879_v47 = vpack.i.bf16 %v999_v16, %v1023_v38  ;;  %v950_v48 = vrot.slane %v936_v63, 7 }
 0x18e   : > { %v898_v51 = vmax.f32 %v892_v45, %v849_v44  ;;  %v900_v40 = vrot.slane %v849_v44, 1  ;;  %v920_v36 = vmax.f32 %v914_v37, %v849_v44  ;;  %v840_v52 = vadd.f32 %v2411_v42, %v839_v7 }
 0x18f   : > { %1880 = vrot.lane.b32.xlu1 %v1879_v47, %s2031_s14  ;;  %v841_v28 = vpop.f32.mrf.mxu0  ;;  %v965_v55 = vsel %vm960_vm13, 0.0, %v950_v48  ;;  %v908_v39 = vrot.slane %v849_v44, 2  ;;  %1772 = vmatpush3.bf16.msra.mxu1 %v1945_v25 }
 0x190   : > { %v929_v5 = vmax.f32 %v920_v36, %v900_v40  ;;  %v907_v57 = vmax.f32 %v898_v51, %v900_v40  ;;  %v2480_v58 = vsel %vm968_vm14, %v965_v55, 0.0  ;;  %v850_v59 = vmax.f32 %v840_v52, 0.0  ;;  %1773 = vmatprep.subr.bf16.mxu1 %v1946_v27 }
 0x191   : > { %v1884_v2 = vpack.i.bf16 %v1003_v20, %v2480_v58  ;;  %v1031_v42 = vrot.slane %v2480_v58, 1  ;;  %v1035_v60 = vrot.slane %v2480_v58, 2 }
 0x192   : > { %v937_v62 = vmax.f32 %v929_v5, %v908_v39  ;;  %v915_v3 = vmax.f32 %v907_v57, %v908_v39  ;;  %v923_v9 = vrot.slane %v850_v59, 1  ;;  %v931_v16 = vrot.slane %v850_v59, 2 }
 0x193   : > { %1885 = vrot.lane.b32.xlu0 %v1884_v2, %s2033_s22  ;;  %v1889_v53 = vpack.i.bf16 %v2463_v35, %v1031_v42  ;;  %v1091_v6 = vrot.slane %v1035_v60, 5  ;;  %v1097_v11 = vrot.slane %v1035_v60, 6  ;;  %v1103_v13 = vrot.slane %v1035_v60, 7  ;;  %1774 = vmatpush3.bf16.msra.mxu1 %v1947_v31 }
 0x194   : > { %v921_v8 = vmax.f32 %v915_v3, %v850_v59  ;;  %v951_v10 = vrot.slane %v937_v62, 7  ;;  %1806 = vmatprep.subr.bf16.mxu1 %v2036_v26 }
 0x195   : > { %1890 = vrot.lane.b32.xlu1 %v1889_v53, %s2030_s13  ;;  %v1137_v14 = vsel %vm428_vm0, %v1133_v4, %v1091_v6 }
 0x196   : > { %v930_v15 = vmax.f32 %v921_v8, %v923_v9  ;;  %v966_v21 = vsel %vm960_vm13, 0.0, %v951_v10  ;;  %v1141_v18 = vsel %vm1138_vm1, %v1137_v14, %v1097_v11 }
 0x197   : > { %v2502_v19 = vsel %vm968_vm14, %v966_v21, 0.0  ;;  %v1145_v20 = vsel %vm1142_vm2, %v1141_v18, %v1103_v13 }
 0x198   : > { %v938_v22 = vmax.f32 %v930_v15, %v931_v16  ;;  %v1054_v24 = vrot.slane %v2502_v19, 2 }
 0x19a   : > { %v952_v29 = vrot.slane %v938_v22, 7  ;;  %v1894_v30 = vpack.i.bf16 %v1031_v42, %v1054_v24 }
 0x19c   : > { %1895 = vrot.lane.b32.xlu0 %v1894_v30, %s2031_s14  ;;  %v967_v32 = vsel %vm960_vm13, 0.0, %v952_v29 }
 0x19d   : > { %v975_v34 = vsel %vm968_vm14, %v967_v32, 0.0  ;;  %v1052_v32 = vrot.slane %v2502_v19, 1 }
 0x19e   : > { %v1899_v37 = vpack.i.bf16 %v1035_v60, %v975_v34  ;;  %v1066_v17 = vrot.slane %v975_v34, 2  ;;  %v1062_v38 = vrot.slane %v975_v34, 1  ;;  %v1021_v60 = vrot.slane %v2463_v35, 1 }
 0x1a0   : > { %1900 = vrot.lane.b32.xlu1 %v1899_v37, %s2033_s22  ;;  %v1117_v63 = vrot.slane %v1066_v17, 3  ;;  %v1904_v43 = vpack.i.bf16 %v2502_v19, %v1062_v38  ;;  %v1111_v44 = vrot.slane %v1066_v17, 2  ;;  %v1123_v45 = vrot.slane %v1066_v17, 4 }
 0x1a2   : > { %1905 = vrot.lane.b32.xlu0 %v1904_v43, %s2030_s13  ;;  %v1149_v46 = vsel %vm1146_vm3, %v1145_v20, %v1111_v44 }
 0x1a3   : > { %v1152_v7 = vsel %vm968_vm14, %v1149_v46, %v1117_v63 }
 0x1a4   : > { %v2527_v47 = vpack.c.bf16 %v1123_v45, %v1152_v7 }
 0x1f8   : > { %v1866_v48 = vpop.permute.xlu0 %1865 }
 0x1f9   : > { %v1867_v49 = vunpack.i.l.bf16 %v1866_v48  ;;  %v1868_v28 = vunpack.i.h.bf16 %v1866_v48 }
 0x1fa   : > { %v1871_v51 = vpop.permute.xlu1 %1870 }
 0x1fb   : > { %v1872_v40 = vunpack.i.l.bf16 %v1871_v51  ;;  %v1008_v36 = vsel %vm629_vm7, %v989_v50, %v1867_v49  ;;  %v1873_v33 = vunpack.i.h.bf16 %v1871_v51  ;;  %v1005_v39 = vsel %vm629_vm7, %v2421_v1, %v1868_v28 }
 0x1fc   : > { %v1876_v52 = vpop.permute.xlu0 %1875 }
 0x1fd   : > { %v1877_v55 = vunpack.i.l.bf16 %v1876_v52  ;;  %v1009_v56 = vsel %vm647_vm9, %v1008_v36, %v1872_v40  ;;  %v1878_v59 = vunpack.i.h.bf16 %v1876_v52  ;;  %v1006_v54 = vsel %vm647_vm9, %v1005_v39, %v1873_v33 }
 0x1ff   : > { %v1010_v57 = vsel %vm665_vm11, %v1009_v56, %v1877_v55  ;;  %v1007_v53 = vsel %vm665_vm11, %v1006_v54, %v1878_v59 }
 0x200   : > { %v1076_v41 = vrot.slane %v1010_v57, 1  ;;  %v1082_v4 = vrot.slane %v1010_v57, 2  ;;  %v1075_v14 = vrot.slane %v1007_v53, 1  ;;  %v1081_v22 = vrot.slane %v1007_v53, 2 }
 0x201   : > { %v1881_v5 = vpop.permute.xlu1 %1880 }
 0x202   : > { %v1882_v2 = vunpack.i.l.bf16 %v1881_v5  ;;  %v1883_v42 = vunpack.i.h.bf16 %v1881_v5  ;;  %v1128_v0 = vsel %vm960_vm13, %v1010_v57, %v1076_v41  ;;  %v1127_v25 = vsel %vm960_vm13, %v1007_v53, %v1075_v14  ;;  %v1949_v41 = vld [vmem:[%s2677_s3 + $0x80] sm:$0xff]   ;;  %v1955_v53 = vld [vmem:[%s2679_s5 + $0x28] sm:$0xff]  }
 0x203   : > { %v1132_v21 = vsel %vm1130_vm15, %v1128_v0, %v1082_v4  ;;  %v1131_v34 = vsel %vm1130_vm15, %v1127_v25, %v1081_v22  ;;  %v1956_v4 = vld [vmem:[%s2679_s5 + $0x60] sm:$0xff]   ;;  %v1963_v0 = vld [vmem:[%s2679_s5 + $0x8] sm:$0xff]  }
 0x204   : > { %v1039_v6 = vsel %vm629_vm7, %v1021_v60, %v1882_v2  ;;  %v1036_v8 = vsel %vm629_vm7, %v2445_v12, %v1883_v42  ;;  %v1948_v60 = vld [vmem:[%s2677_s3 + $0x88] sm:$0xff]  }
 0x205   : > { %v1886_v61 = vpop.permute.xlu0 %1885 }
 0x206   : > { %v1888_v62 = vunpack.i.h.bf16 %v1886_v61  ;;  %v1887_v3 = vunpack.i.l.bf16 %v1886_v61  ;;  %v1950_v61 = vld [vmem:[%s2679_s5 + $0x78] sm:$0xff]  }
 0x207   : > { %v1891_v1 = vpop.permute.xlu1 %1890  ;;  %1784 = vmatprep.subr.bf16.mxu0 %v1950_v61 }
 0x208   : > { %v1040_v9 = vsel %vm647_vm9, %v1039_v6, %v1887_v3  ;;  %v1893_v10 = vunpack.i.h.bf16 %v1891_v1  ;;  %v1892_v11 = vunpack.i.l.bf16 %v1891_v1  ;;  %v1037_v35 = vsel %vm647_vm9, %v1036_v8, %v1888_v62  ;;  %v1951_v62 = vld [vmem:[%s2679_s5 + $0x38] sm:$0xff]   ;;  %v1952_v3 = vld [vmem:[%s2679_s5 + $0x70] sm:$0xff]   ;;  %v1957_v6 = vld [vmem:[%s2679_s5 + $0x20] sm:$0xff]  }
 0x209   : > { %1785 = vmatpush3.bf16.msra.mxu0 %v1951_v62  ;;  %v1958_v1 = vld [vmem:[%s2679_s5 + $0x58] sm:$0xff]  }
 0x20a   : > { %v1041_v13 = vsel %vm665_vm11, %v1040_v9, %v1892_v11  ;;  %v1038_v18 = vsel %vm665_vm11, %v1037_v35, %v1893_v10  ;;  %1786 = vmatprep.subr.bf16.mxu0 %v1952_v3  ;;  %v1959_v8 = vld [vmem:[%s2679_s5 + $0x18] sm:$0xff]   ;;  %v1960_v9 = vld [vmem:[%s2679_s5 + $0x50] sm:$0xff]   ;;  %v1962_v11 = vld [vmem:[%s2679_s5 + $0x48] sm:$0xff]  }
 0x20b   : > { %v1090_v15 = vrot.slane %v1041_v13, 5  ;;  %v1096_v16 = vrot.slane %v1041_v13, 6  ;;  %v1102_v20 = vrot.slane %v1041_v13, 7  ;;  %v1089_v27 = vrot.slane %v1038_v18, 5  ;;  %v1961_v10 = vld [vmem:[%s2679_s5 + $0x10] sm:$0xff]  }
 0x20c   : > { %v1095_v37 = vrot.slane %v1038_v18, 6  ;;  %v1101_v51 = vrot.slane %v1038_v18, 7 }
 0x20d   : > { %v1136_v12 = vsel %vm428_vm0, %v1132_v21, %v1090_v15  ;;  %v1135_v38 = vsel %vm428_vm0, %v1131_v34, %v1089_v27  ;;  %vm2037_vm0 = vmmov 0  }
 0x20e   : > { %v1896_v24 = vpop.permute.xlu0 %1895  ;;  %v1140_v23 = vsel %vm1138_vm1, %v1136_v12, %v1096_v16  ;;  %v1139_v50 = vsel %vm1138_vm1, %v1135_v38, %v1095_v37  ;;  %v1720_v16 = vld [vmem:[%s2678_s4] ss:$0 sm:$0xff] }
 0x20f   : > { %v1144_v29 = vsel %vm1142_vm2, %v1140_v23, %v1102_v20  ;;  %v1898_v30 = vunpack.i.h.bf16 %v1896_v24  ;;  %v1897_v31 = vunpack.i.l.bf16 %v1896_v24  ;;  %v1143_v56 = vsel %vm1142_vm2, %v1139_v50, %v1101_v51 }
 0x211   : > { %v1067_v44 = vsel %vm629_vm7, %v2480_v58, %v1898_v30  ;;  %v1070_v45 = vsel %vm629_vm7, %v1052_v32, %v1897_v31 }
 0x212   : > { %v1901_v17 = vpop.permute.xlu1 %1900 }
 0x213   : > { %v1903_v63 = vunpack.i.h.bf16 %v1901_v17  ;;  %v1902_v43 = vunpack.i.l.bf16 %v1901_v17 }
 0x214   : > { %v1906_v46 = vpop.permute.xlu0 %1905 }
 0x215   : > { %v1068_v7 = vsel %vm647_vm9, %v1067_v44, %v1903_v63  ;;  %v1071_v48 = vsel %vm647_vm9, %v1070_v45, %v1902_v43  ;;  %v1908_v49 = vunpack.i.h.bf16 %v1906_v46  ;;  %v1907_v19 = vunpack.i.l.bf16 %v1906_v46  ;;  %v1964_v43 = vld [vmem:[%s2679_s5 + $0x40] sm:$0xff]  }
 0x216   : > { %v1965_v44 = vld [vmem:[%s2679_s5] sm:$0xff]  }
 0x217   : > { %v1069_v40 = vsel %vm665_vm11, %v1068_v7, %v1908_v49  ;;  %v1072_v36 = vsel %vm665_vm11, %v1071_v48, %v1907_v19 }
 0x218   : > { %v1109_v52 = vrot.slane %v1069_v40, 2  ;;  %v1115_v28 = vrot.slane %v1069_v40, 3  ;;  %v1110_v55 = vrot.slane %v1072_v36, 2  ;;  %v1116_v58 = vrot.slane %v1072_v36, 3 }
 0x219   : > { %v1122_v33 = vrot.slane %v1072_v36, 4  ;;  %v1121_v5 = vrot.slane %v1069_v40, 4 }
 0x21a   : > { %v1148_v39 = vsel %vm1146_vm3, %v1144_v29, %v1110_v55  ;;  %v1147_v57 = vsel %vm1146_vm3, %v1143_v56, %v1109_v52 }
 0x21b   : > { %v1151_v59 = vsel %vm968_vm14, %v1148_v39, %v1116_v58  ;;  %v1150_v2 = vsel %vm968_vm14, %v1147_v57, %v1115_v28  ;;  %v1458_v39 = vld [vmem:[%s2680_s6] sm:$0x1] }
 0x21c   : > { %v1154_v54 = vpack.c.bf16 %v1122_v33, %v1151_v59  ;;  %v1153_v42 = vpack.c.bf16 %v1121_v5, %v1150_v2 }
 0x21e   : > { %1342 = vmatprep.mubr.bf16.mxu1 %v1154_v54 }
 0x21f   : > { %1343 = vmatmul.mubr.bf16.vlgmr.msra.gmra.mxu1 %v1153_v42 }
 0x220   : > { %1807 = vmatpush3.bf16.msra.mxu1 %v1948_v60  ;;  %1810 = vmatprep.mubr.msk.bf16.mxu1 %vm2037_vm0, %v2036_v26 }
 0x221   : > { %1808 = vmatprep.subr.bf16.mxu1 %v2036_v26  ;;  %v1953_v26 = vld [vmem:[%s2679_s5 + $0x30] sm:$0xff]  }
 0x222   : > { %1787 = vmatpush3.bf16.msra.mxu0 %v1953_v26 }
 0x224   : > { %1809 = vmatpush3.bf16.msra.mxu1 %v1949_v41 }
 0x227   : > { %1811 = vmatmul.mubr.msk.bf16.vlgmr.msra.gmra.mxu1 %vm629_vm7, %v2527_v47  ;;  %v1954_v47 = vld [vmem:[%s2679_s5 + $0x68] sm:$0xff]  }
 0x228   : > { %1788 = vmatprep.subr.bf16.mxu0 %v1954_v47 }
 0x229   : > { %1789 = vmatpush3.bf16.msra.mxu0 %v1955_v53 }
 0x22a   : > { %1790 = vmatprep.subr.bf16.mxu0 %v1956_v4 }
 0x22d   : > { %1791 = vmatpush3.bf16.msra.mxu0 %v1957_v6 }
 0x22e   : > { %1792 = vmatprep.subr.bf16.mxu0 %v1958_v1 }
 0x231   : > { %1793 = vmatpush3.bf16.msra.mxu0 %v1959_v8 }
 0x232   : > { %1794 = vmatprep.subr.bf16.mxu0 %v1960_v9 }
 0x235   : > { %1795 = vmatpush3.bf16.msra.mxu0 %v1961_v10 }
 0x236   : > { %1796 = vmatprep.subr.bf16.mxu0 %v1962_v11 }
 0x239   : > { %1797 = vmatpush3.bf16.msra.mxu0 %v1963_v0 }
 0x23a   : > { %1798 = vmatprep.subr.bf16.mxu0 %v1964_v43 }
 0x23d   : > { %1799 = vmatpush3.bf16.msra.mxu0 %v1965_v44 }
 0x2df   : > { %v1775_v35 = vpop.f32.mrf.mxu1 }
 0x2e1   : > { %v1776_v13 = vpop.f32.mrf.mxu1 }
 0x2e2   : > { %v1777_v14 = vadd.f32 %v1776_v13, %v1775_v35 }
 0x2e3   : > { %v1778_v15 = vpop.f32.mrf.mxu1 }
 0x2e4   : > { %v1345_v20 = vadd.f32 %v1777_v14, %v1720_v16 }
 0x2e5   : > { %v1779_v21 = vpop.f32.mrf.mxu1 }
 0x2e6   : > { %v1780_v18 = vadd.f32 %v1779_v21, %v1778_v15 }
 0x2e7   : > { %v1385_v12 = vpop.f32.mrf.mxu1 }
 0x2e8   : > { %v1386_v22 = vadd.f32 %v1385_v12, %v1345_v20  ;;  %v1348_v25 = vadd.f32 %v1780_v18, %v1720_v16 }
 0x2e9   : > { %v1812_v24 = vpop.f32.mrf.mxu1 }
 0x2ea   : > { %v1392_v23 = vmax.f32 %v1386_v22, 0.0 }
 0x2eb   : > { %v1388_v27 = vpop.f32.mrf.mxu1 }
 0x2ec   : > { %v1395_v29 = vrot.slane %v1392_v23, 1  ;;  %v1389_v30 = vadd.f32 %v1388_v27, %v1348_v25  ;;  %v1398_v37 = vrot.slane %v1392_v23, 3  ;;  %v1401_v17 = vrot.slane %v1392_v23, 4 }
 0x2ed   : > { %v1813_v31 = vpop.f32.mrf.mxu1 }
 0x2ee   : > { %v1393_v32 = vmax.f32 %v1389_v30, 0.0  ;;  %v1397_v34 = vadd.f32 %v1395_v29, %v1392_v23 }
 0x2f0   : > { %v1400_v38 = vadd.f32 %v1398_v37, %v1397_v34  ;;  %v1406_v63 = vrot.slane %v1393_v32, 4 }
 0x2f2   : > { %v1403_v45 = vadd.f32 %v1401_v17, %v1400_v38  ;;  %v1408_v46 = vadd.f32 %v1406_v63, %v1400_v38 }
 0x2f4   : > { %v1404_v7 = vmul.f32 0.25, %v1403_v45  ;;  %v1409_v48 = vmul.f32 0.25, %v1408_v46 }
 0x2f6   : > { %v1418_v49 = vrot.slane %v1409_v48, 4  ;;  %v1411_v19 = vrot.slane %v1404_v7, 1  ;;  %v1415_v52 = vrot.slane %v1404_v7, 3 }
 0x2f8   : > { %v1909_v50 = vpack.i.bf16 %v1411_v19, %v1418_v49 }
 0x2fa   : > { %1910 = vrot.lane.b32.xlu1 %v1909_v50, %s2033_s22  ;;  %s1756_s22 = sshll.u32 %s2100_s28, 4  ;;  %s2038_s28 = smov [#allocation2]  }
 0x2fb   : > { %s2639_s8 = scalar_lea.hbm %s2681_s7, %s1756_s22  ;;  %s1970_s16 = sshll.u32 %s2038_s28, 4  ;;  %s1971_s16 = int_to_ptr.vmem [resolvable:$false] %s1970_s16 }
 0x2fc   : > { %s1972_s18 = scalar_lea.vmem %s1971_s16, 32  ;;  %p1973_p0 = scmp.lt.s32.totalorder %s1610_s17, %s1971_s16 }
 0x2fd   : > { %p1974_p1 = scmp.lt.s32.totalorder %s1972_s18, %s1966_s15 }
 0x2ff   : > { %p1975_p2 = por %p1974_p1, %p1973_p0 }
 0x301   : > { %p1976_p3 = pnand %p1975_p2, %p1969_p13 }
 0x36c   : > { %v1911_v51 = vpop.permute.xlu1 %1910 }
 0x36d   : > { %v1913_v40 = vunpack.i.h.bf16 %v1911_v51  ;;  %v1912_v36 = vunpack.i.l.bf16 %v1911_v51 }
 0x36f   : > { %v1422_v28 = vsel %vm647_vm9, %v1404_v7, %v1913_v40  ;;  %v1423_v55 = vsel %vm647_vm9, %v1415_v52, %v1912_v36 }
 0x370   : > { %v1424_v58 = vpack.c.bf16 %v1422_v28, %v1422_v28  ;;  %v1425_v56 = vpack.c.bf16 %v1423_v55, %v1423_v55 }
 0x372   : > { %1587 = vmatprep.mubr.bf16.mxu0 %v1425_v56 }
 0x373   : > { %1588 = vmatmul.mubr.bf16.vlgmr.msra.gmra.mxu0 %v1424_v58 }
 0x433   : > { %v1800_v33 = vpop.f32.mrf.mxu0 }
 0x435   : > { %v1801_v5 = vpop.f32.mrf.mxu0 }
 0x436   : > { %v1802_v57 = vadd.f32 %v1801_v5, %v1800_v33 }
 0x437   : > { %v1803_v59 = vpop.f32.mrf.mxu0 }
 0x438   : > { %v1590_v2 = vadd.f32 %v1802_v57, %v1458_v39 }
 0x439   : > { %v1804_v54 = vpop.f32.mrf.mxu0 }
 0x43a   : > { %1595 = vst [vmem:[%s270_s29] sm:$0x1] %v1590_v2 }
 0x43b   : > { %1979 = shalt.err (!%p1976_p3)
}
 0x43c   : > { %s1980_s19 = scalar_lea.hbm %s2639_s8, 16  ;;  %s1984_s14 = scalar_lea.hbm %s2681_s7, 32 }
 0x43d   : > { %p1981_p4 = scmp.ne.s32.totalorder %s2639_s8, %s1980_s19  ;;  %p1985_p9 = scmp.lt.s32.totalorder %s2639_s8, %s2681_s7 }
 0x43e   : > { %p1986_p10 = scmp.lt.s32.totalorder %s1984_s14, %s1980_s19 }
 0x43f   : > { %p1982_p7 = pnand %p1981_p4, %p2117_p5 }
 0x440   : > { %p1987_p11 = por %p1986_p10, %p1985_p9 }
 0x441   : > { %p1983_p8 = pneg %p1982_p7 }
 0x443   : > { %p1988_p12 = pnand %p1987_p11, %p1983_p8 }
 0x445   : > { %1991 = shalt.err (!%p1988_p12)
}
 0x446   : > { %1815 = dma.vmem_to_hbm [thread:$0]  (%p2117_p5), %s1610_s17, 16, %s2639_s8, %s1597_s9  }
 0x447 PF: > { %p1821_p13 = scmp.ge.s32.totalorder %s2026_s27, 2  ;;  %s1621_s20 = sand.u32 1, %s2014_s24  }
 0x448   : > { %s1622_s21 = scalar_lea.sflag [#allocation3], %s1621_s20 }
 0x449   : > { %p1818_p0 = pnand %p1821_p13, %p2121_p6 }
 0x44b   : > { %p1819_p1 = pneg %p1818_p0 }
 0x44d   : > { %2009 = dma.done.wait (%p1819_p1), %s1622_s21, 16  }
 0x44e   : > { %2011 = vsyncadd (%p1819_p1), %s1622_s21, 4294967280  ;;  %p17_p2 = scmp.ge.s32.totalorder %s2104_s30, 4   ;;  %s2688_s24 = smov %s2018_s25 }
 0x44f   : > { %s2689_s25 = smov %s2022_s26  ;;  %s2690_s26 = smov %s2115_s10 }
 0x450   : > { %s2691_s27 = smov %s2104_s30  ;;  %19 = sbr.rel (!%p17_p2) target bundleno = 3 (0x3), region = 83 }
 0x455   :  { %1626 = vsyncpa [#allocation3], 1 }
 0x456   :  { %1628 = vsyncpa [#allocation3 + $0x1], 1 }

</bundles_post_ra>
